<compile_context>
chip_gen: v6e
topology: v6e:2x2x1
jax: 0.10.0
libtpu: 0.0.40
codegen_flags: <defaults>
</compile_context>

<pallas_src>
import functools

import jax
import jax.numpy as jnp
from jax import lax
from jax.experimental import pallas as pl
from jax.experimental.pallas import tpu as pltpu


def _mhsa_kernel(x_ref, wqkv_ref, wfc_ref, o_ref,
                 *, num_heads, head_dim, batch_block):
    """One grid step == `batch_block` batch elements.

    x_ref    : (NB, C, S)  channel-major tokens (free view of NCHW)
    wqkv_ref : (C, 3*D)    fused Q|K|V projection (x @ W form)
    wfc_ref  : (D, D)      output projection
    o_ref    : (NB, S, D)  attention output (before the NCHW re-view)
    """
    D = num_heads * head_dim
    w_qkv = wqkv_ref[...]
    w_fc = wfc_ref[...]

    # Static loop over the batch elements in this block (NB is small).
    for b in range(batch_block):
        x_cs = x_ref[b].astype(jnp.float32)                       # (C, S)

        # Fused QKV projection: contract over C (dim 0 of both operands), so
        # the x tile never needs an explicit transpose.  Result is (S, 3D).
        qkv = lax.dot_general(x_cs, w_qkv, (((0,), (0,)), ((), ())),
                              preferred_element_type=jnp.float32)
        q = qkv[:, 0 * D:1 * D]                                    # (S, D)
        k = qkv[:, 1 * D:2 * D]                                    # (S, D)
        v = qkv[:, 2 * D:3 * D]                                    # (S, D)

        head_outs = []
        for h in range(num_heads):                                 # static loop
            lo, hi = h * head_dim, (h + 1) * head_dim
            qh = q[:, lo:hi]                                       # (S, hd)
            kh = k[:, lo:hi]                                       # (S, hd)
            vh = v[:, lo:hi]                                       # (S, hd)

            # energy = Q K^T via dot_general contracting dim 1 of both
            # operands (no explicit XLU transpose of kh).
            # NOTE: no 1/sqrt(head_dim) scaling, matching the reference module.
            energy = lax.dot_general(qh, kh, (((1,), (1,)), ((), ())),
                                     preferred_element_type=jnp.float32)

            # max-stabilized softmax over the last axis (f32 throughout).
            m = jnp.max(energy, axis=-1, keepdims=True)
            p = jnp.exp(energy - m)
            denom = jnp.sum(p, axis=-1, keepdims=True)
            # approx=False keeps the result within the 1e-4 check; the EUP
            # approx path is an optional trade-off at larger S.
            attn = p * pl.reciprocal(denom, approx=False)          # (S, S)

            head_outs.append(jnp.dot(attn, vh,
                                     preferred_element_type=jnp.float32))

        # Concatenate heads along lanes and apply fc with ONE K=128 matmul.
        concat = jnp.concatenate(head_outs, axis=-1)               # (S, D)
        out = jnp.dot(concat, w_fc, preferred_element_type=jnp.float32)
        o_ref[b] = out.astype(o_ref.dtype)


def _pick_batch_block(n_batch):
    """Collapse the batch grid on known single-TensorCore chips (v5e/v6e);
    keep a per-batch parallel grid otherwise (v7x megacore, v4, ...)."""
    try:
        kind = jax.devices()[0].device_kind.lower()
    except Exception:
        return 1
    single_tc = ("v5e" in kind or "v5 lite" in kind or "v5lite" in kind or
                 "v6e" in kind or "v6 lite" in kind or "v6lite" in kind)
    return n_batch if single_tc else 1


def multi_head_self_attention(x_nchw, wq, wk, wv, wfc, *, num_heads):
    """x_nchw: (N, C, H, W); weights given as (C_in, D) / (D, D) (x @ W form,
    i.e. the transpose of torch.nn.Linear's (out, in) weight)."""
    N, C, H, W = x_nchw.shape
    S = H * W
    D = wq.shape[1]
    head_dim = D // num_heads
    assert D == 128, "reference module hard-codes out.view(N, 128, H, W)"

    # NCHW -> (N, C, S) is a free row-major view: no HBM permute pass.
    x_ncs = x_nchw.reshape(N, C, S)
    # Fuse the three projections into one (C, 3D) weight (tiny one-time op).
    w_qkv = jnp.concatenate([wq, wk, wv], axis=1)

    NB = _pick_batch_block(N)
    if N % NB != 0:
        NB = 1
    grid = (N // NB,)

    kernel = functools.partial(_mhsa_kernel, num_heads=num_heads,
                               head_dim=head_dim, batch_block=NB)

    out_nsd = pl.pallas_call(
        kernel,
        out_shape=jax.ShapeDtypeStruct((N, S, D), x_nchw.dtype),
        grid_spec=pltpu.PrefetchScalarGridSpec(
            num_scalar_prefetch=0,
            grid=grid,
            in_specs=[
                pl.BlockSpec((NB, C, S), lambda b: (b, 0, 0)),    # x (chan-major)
                pl.BlockSpec((C, 3 * D), lambda b: (0, 0)),       # fused Wqkv
                pl.BlockSpec((D, D), lambda b: (0, 0)),           # Wfc
            ],
            out_specs=pl.BlockSpec((NB, S, D), lambda b: (b, 0, 0)),
        ),
        compiler_params=pltpu.CompilerParams(
            dimension_semantics=("parallel",)),
    )(x_ncs, w_qkv, wfc)

    # torch: out.view(N, 128, H, W) on a contiguous (N, S, D) tensor is a raw
    # row-major reinterpretation; jnp.reshape does the same thing.
    return out_nsd.reshape(N, 128, H, W)


def _reference(x_nchw, wq, wk, wv, wfc, *, num_heads):
    """Pure-JAX reference mirroring the PyTorch forward, for verification."""
    N, C, H, W = x_nchw.shape
    S = H * W
    D = wq.shape[1]
    hd = D // num_heads
    x = jnp.transpose(x_nchw.reshape(N, C, S), (0, 2, 1))          # (N,S,C)
    q = x @ wq
    k = x @ wk
    v = x @ wv

    def split(t):
        return jnp.transpose(t.reshape(N, S, num_heads, hd), (0, 2, 1, 3))

    qh, kh, vh = split(q), split(k), split(v)
    energy = jnp.einsum('nhqd,nhkd->nhqk', qh, kh)
    attn = jax.nn.softmax(energy, axis=-1)
    out = jnp.einsum('nhqk,nhkd->nhqd', attn, vh)
    out = jnp.transpose(out, (0, 2, 1, 3)).reshape(N, S, D)
    out = out @ wfc
    return out.reshape(N, 128, H, W)


if __name__ == "__main__":
    # Small shapes consistent with the module (out_channels must be 128).
    N, C_in, H, W = 2, 16, 8, 8
    out_channels, num_heads = 128, 4

    key = jax.random.PRNGKey(0)
    k_x, k_q, k_k, k_v, k_fc = jax.random.split(key, 5)

    x = jax.random.normal(k_x, (N, C_in, H, W), dtype=jnp.float32)
    # Deterministic synthetic weights, stored in (in, out) layout (x @ W form).
    scale_in = 1.0 / jnp.sqrt(jnp.float32(C_in))
    scale_d = 1.0 / jnp.sqrt(jnp.float32(out_channels))
    wq = jax.random.uniform(k_q, (C_in, out_channels), jnp.float32,
                            -scale_in, scale_in)
    wk = jax.random.uniform(k_k, (C_in, out_channels), jnp.float32,
                            -scale_in, scale_in)
    wv = jax.random.uniform(k_v, (C_in, out_channels), jnp.float32,
                            -scale_in, scale_in)
    wfc = jax.random.uniform(k_fc, (out_channels, out_channels), jnp.float32,
                             -scale_d, scale_d)

    out = multi_head_self_attention(x, wq, wk, wv, wfc, num_heads=num_heads)
    out = jax.block_until_ready(out)

    ref = _reference(x, wq, wk, wv, wfc, num_heads=num_heads)
    assert out.shape == (N, 128, H, W), out.shape
    assert jnp.allclose(out, ref, atol=1e-4, rtol=1e-4), \
        float(jnp.max(jnp.abs(out - ref)))

    print("KERNEL_OK")
</pallas_src>

<mosaic_0001>
module attributes {stable_mosaic.version = 11 : i64} {
  func.func @_mhsa_kernel(%arg0: i32, %arg1: memref<1x16x64xf32, #tpu.memory_space<vmem>>, %arg2: memref<16x384xf32, #tpu.memory_space<vmem>>, %arg3: memref<128x128xf32, #tpu.memory_space<vmem>>, %arg4: memref<1x64x128xf32, #tpu.memory_space<vmem>>) attributes {dimension_semantics = [#tpu.dimension_semantics<parallel>], iteration_bounds = array<i64: 2>, scalar_prefetch = 0 : i64, scratch_operands = 0 : i64, tpu.core_type = #tpu.core_type<tc>, window_params = [{transform_indices = @transform_0, window_bounds = array<i64: 1, 16, 64>}, {pipeline_mode = #tpu.pipeline_mode<synchronous>, transform_indices = @transform_1, window_bounds = array<i64: 16, 384>}, {pipeline_mode = #tpu.pipeline_mode<synchronous>, transform_indices = @transform_2, window_bounds = array<i64: 128, 128>}, {transform_indices = @transform_3, window_bounds = array<i64: 1, 64, 128>}]} {
    %c0 = arith.constant 0 : index
    %c0_0 = arith.constant 0 : index
    %0 = vector.load %arg2[%c0, %c0_0] : memref<16x384xf32, #tpu.memory_space<vmem>>, vector<16x384xf32>
    %c0_1 = arith.constant 0 : index
    %c0_2 = arith.constant 0 : index
    %1 = vector.load %arg3[%c0_1, %c0_2] : memref<128x128xf32, #tpu.memory_space<vmem>>, vector<128x128xf32>
    %c0_3 = arith.constant 0 : index
    %c0_4 = arith.constant 0 : index
    %c0_5 = arith.constant 0 : index
    %2 = vector.load %arg1[%c0_3, %c0_4, %c0_5] : memref<1x16x64xf32, #tpu.memory_space<vmem>>, vector<1x16x64xf32>
    %3 = vector.shape_cast %2 : vector<1x16x64xf32> to vector<16x64xf32>
    %cst = arith.constant dense<0.000000e+00> : vector<64x384xf32>
    %4 = tpu.matmul %3, %0, %cst {dimension_numbers = #tpu.dot_dimension_numbers<[0], [0], [1], [1], [0, 1, 1, 1], [], []>} : vector<16x64xf32>, vector<16x384xf32>, vector<64x384xf32> -> vector<64x384xf32>
    %5 = vector.extract_strided_slice %4 {offsets = [0, 0], sizes = [64, 128], strides = [1, 1]} : vector<64x384xf32> to vector<64x128xf32>
    %6 = vector.extract_strided_slice %4 {offsets = [0, 128], sizes = [64, 128], strides = [1, 1]} : vector<64x384xf32> to vector<64x128xf32>
    %7 = vector.extract_strided_slice %4 {offsets = [0, 256], sizes = [64, 128], strides = [1, 1]} : vector<64x384xf32> to vector<64x128xf32>
    %8 = vector.extract_strided_slice %5 {offsets = [0, 0], sizes = [64, 32], strides = [1, 1]} : vector<64x128xf32> to vector<64x32xf32>
    %9 = vector.extract_strided_slice %6 {offsets = [0, 0], sizes = [64, 32], strides = [1, 1]} : vector<64x128xf32> to vector<64x32xf32>
    %10 = vector.extract_strided_slice %7 {offsets = [0, 0], sizes = [64, 32], strides = [1, 1]} : vector<64x128xf32> to vector<64x32xf32>
    %cst_6 = arith.constant dense<0.000000e+00> : vector<64x64xf32>
    %11 = tpu.matmul %8, %9, %cst_6 {dimension_numbers = #tpu.dot_dimension_numbers<[1], [1], [0], [0], [0, 0, 1, 0], [], []>} : vector<64x32xf32>, vector<64x32xf32>, vector<64x64xf32> -> vector<64x64xf32>
    %cst_7 = arith.constant dense<0xFF800000> : vector<64xf32>
    %12 = vector.multi_reduction <maximumf>, %11, %cst_7 [1] : vector<64x64xf32> to vector<64xf32>
    %13 = vector.shape_cast %12 : vector<64xf32> to vector<64x1xf32>
    %14 = vector.broadcast %13 : vector<64x1xf32> to vector<64x64xf32>
    %15 = arith.subf %11, %14 : vector<64x64xf32>
    %16 = math.exp %15 : vector<64x64xf32>
    %cst_8 = arith.constant dense<0.000000e+00> : vector<64xf32>
    %17 = vector.multi_reduction <add>, %16, %cst_8 [1] : vector<64x64xf32> to vector<64xf32>
    %18 = vector.shape_cast %17 : vector<64xf32> to vector<64x1xf32>
    %19 = tpu.reciprocal %18 : vector<64x1xf32> -> vector<64x1xf32>
    %20 = vector.broadcast %19 : vector<64x1xf32> to vector<64x64xf32>
    %21 = arith.mulf %16, %20 : vector<64x64xf32>
    %cst_9 = arith.constant dense<0.000000e+00> : vector<64x32xf32>
    %22 = tpu.matmul %21, %10, %cst_9 {dimension_numbers = #tpu.dot_dimension_numbers<[1], [0], [0], [1], [0, 0, 1, 1], [], []>} : vector<64x64xf32>, vector<64x32xf32>, vector<64x32xf32> -> vector<64x32xf32>
    %23 = vector.extract_strided_slice %5 {offsets = [0, 32], sizes = [64, 32], strides = [1, 1]} : vector<64x128xf32> to vector<64x32xf32>
    %24 = vector.extract_strided_slice %6 {offsets = [0, 32], sizes = [64, 32], strides = [1, 1]} : vector<64x128xf32> to vector<64x32xf32>
    %25 = vector.extract_strided_slice %7 {offsets = [0, 32], sizes = [64, 32], strides = [1, 1]} : vector<64x128xf32> to vector<64x32xf32>
    %cst_10 = arith.constant dense<0.000000e+00> : vector<64x64xf32>
    %26 = tpu.matmul %23, %24, %cst_10 {dimension_numbers = #tpu.dot_dimension_numbers<[1], [1], [0], [0], [0, 0, 1, 0], [], []>} : vector<64x32xf32>, vector<64x32xf32>, vector<64x64xf32> -> vector<64x64xf32>
    %cst_11 = arith.constant dense<0xFF800000> : vector<64xf32>
    %27 = vector.multi_reduction <maximumf>, %26, %cst_11 [1] : vector<64x64xf32> to vector<64xf32>
    %28 = vector.shape_cast %27 : vector<64xf32> to vector<64x1xf32>
    %29 = vector.broadcast %28 : vector<64x1xf32> to vector<64x64xf32>
    %30 = arith.subf %26, %29 : vector<64x64xf32>
    %31 = math.exp %30 : vector<64x64xf32>
    %cst_12 = arith.constant dense<0.000000e+00> : vector<64xf32>
    %32 = vector.multi_reduction <add>, %31, %cst_12 [1] : vector<64x64xf32> to vector<64xf32>
    %33 = vector.shape_cast %32 : vector<64xf32> to vector<64x1xf32>
    %34 = tpu.reciprocal %33 : vector<64x1xf32> -> vector<64x1xf32>
    %35 = vector.broadcast %34 : vector<64x1xf32> to vector<64x64xf32>
    %36 = arith.mulf %31, %35 : vector<64x64xf32>
    %cst_13 = arith.constant dense<0.000000e+00> : vector<64x32xf32>
    %37 = tpu.matmul %36, %25, %cst_13 {dimension_numbers = #tpu.dot_dimension_numbers<[1], [0], [0], [1], [0, 0, 1, 1], [], []>} : vector<64x64xf32>, vector<64x32xf32>, vector<64x32xf32> -> vector<64x32xf32>
    %38 = vector.extract_strided_slice %5 {offsets = [0, 64], sizes = [64, 32], strides = [1, 1]} : vector<64x128xf32> to vector<64x32xf32>
    %39 = vector.extract_strided_slice %6 {offsets = [0, 64], sizes = [64, 32], strides = [1, 1]} : vector<64x128xf32> to vector<64x32xf32>
    %40 = vector.extract_strided_slice %7 {offsets = [0, 64], sizes = [64, 32], strides = [1, 1]} : vector<64x128xf32> to vector<64x32xf32>
    %cst_14 = arith.constant dense<0.000000e+00> : vector<64x64xf32>
    %41 = tpu.matmul %38, %39, %cst_14 {dimension_numbers = #tpu.dot_dimension_numbers<[1], [1], [0], [0], [0, 0, 1, 0], [], []>} : vector<64x32xf32>, vector<64x32xf32>, vector<64x64xf32> -> vector<64x64xf32>
    %cst_15 = arith.constant dense<0xFF800000> : vector<64xf32>
    %42 = vector.multi_reduction <maximumf>, %41, %cst_15 [1] : vector<64x64xf32> to vector<64xf32>
    %43 = vector.shape_cast %42 : vector<64xf32> to vector<64x1xf32>
    %44 = vector.broadcast %43 : vector<64x1xf32> to vector<64x64xf32>
    %45 = arith.subf %41, %44 : vector<64x64xf32>
    %46 = math.exp %45 : vector<64x64xf32>
    %cst_16 = arith.constant dense<0.000000e+00> : vector<64xf32>
    %47 = vector.multi_reduction <add>, %46, %cst_16 [1] : vector<64x64xf32> to vector<64xf32>
    %48 = vector.shape_cast %47 : vector<64xf32> to vector<64x1xf32>
    %49 = tpu.reciprocal %48 : vector<64x1xf32> -> vector<64x1xf32>
    %50 = vector.broadcast %49 : vector<64x1xf32> to vector<64x64xf32>
    %51 = arith.mulf %46, %50 : vector<64x64xf32>
    %cst_17 = arith.constant dense<0.000000e+00> : vector<64x32xf32>
    %52 = tpu.matmul %51, %40, %cst_17 {dimension_numbers = #tpu.dot_dimension_numbers<[1], [0], [0], [1], [0, 0, 1, 1], [], []>} : vector<64x64xf32>, vector<64x32xf32>, vector<64x32xf32> -> vector<64x32xf32>
    %53 = vector.extract_strided_slice %5 {offsets = [0, 96], sizes = [64, 32], strides = [1, 1]} : vector<64x128xf32> to vector<64x32xf32>
    %54 = vector.extract_strided_slice %6 {offsets = [0, 96], sizes = [64, 32], strides = [1, 1]} : vector<64x128xf32> to vector<64x32xf32>
    %55 = vector.extract_strided_slice %7 {offsets = [0, 96], sizes = [64, 32], strides = [1, 1]} : vector<64x128xf32> to vector<64x32xf32>
    %cst_18 = arith.constant dense<0.000000e+00> : vector<64x64xf32>
    %56 = tpu.matmul %53, %54, %cst_18 {dimension_numbers = #tpu.dot_dimension_numbers<[1], [1], [0], [0], [0, 0, 1, 0], [], []>} : vector<64x32xf32>, vector<64x32xf32>, vector<64x64xf32> -> vector<64x64xf32>
    %cst_19 = arith.constant dense<0xFF800000> : vector<64xf32>
    %57 = vector.multi_reduction <maximumf>, %56, %cst_19 [1] : vector<64x64xf32> to vector<64xf32>
    %58 = vector.shape_cast %57 : vector<64xf32> to vector<64x1xf32>
    %59 = vector.broadcast %58 : vector<64x1xf32> to vector<64x64xf32>
    %60 = arith.subf %56, %59 : vector<64x64xf32>
    %61 = math.exp %60 : vector<64x64xf32>
    %cst_20 = arith.constant dense<0.000000e+00> : vector<64xf32>
    %62 = vector.multi_reduction <add>, %61, %cst_20 [1] : vector<64x64xf32> to vector<64xf32>
    %63 = vector.shape_cast %62 : vector<64xf32> to vector<64x1xf32>
    %64 = tpu.reciprocal %63 : vector<64x1xf32> -> vector<64x1xf32>
    %65 = vector.broadcast %64 : vector<64x1xf32> to vector<64x64xf32>
    %66 = arith.mulf %61, %65 : vector<64x64xf32>
    %cst_21 = arith.constant dense<0.000000e+00> : vector<64x32xf32>
    %67 = tpu.matmul %66, %55, %cst_21 {dimension_numbers = #tpu.dot_dimension_numbers<[1], [0], [0], [1], [0, 0, 1, 1], [], []>} : vector<64x64xf32>, vector<64x32xf32>, vector<64x32xf32> -> vector<64x32xf32>
    %68 = tpu.concatenate %22, %37, %52, %67 in 1 : vector<64x32xf32>, vector<64x32xf32>, vector<64x32xf32>, vector<64x32xf32> -> vector<64x128xf32>
    %cst_22 = arith.constant dense<0.000000e+00> : vector<64x128xf32>
    %69 = tpu.matmul %68, %1, %cst_22 {dimension_numbers = #tpu.dot_dimension_numbers<[1], [0], [0], [1], [0, 0, 1, 1], [], []>} : vector<64x128xf32>, vector<128x128xf32>, vector<64x128xf32> -> vector<64x128xf32>
    %c0_23 = arith.constant 0 : index
    %c0_24 = arith.constant 0 : index
    %c0_25 = arith.constant 0 : index
    %70 = vector.load %arg4[%c0_23, %c0_24, %c0_25] : memref<1x64x128xf32, #tpu.memory_space<vmem>>, vector<1x64x128xf32>
    %71 = vector.shape_cast %70 : vector<1x64x128xf32> to vector<64x128xf32>
    %72 = vector.shape_cast %69 : vector<64x128xf32> to vector<1x64x128xf32>
    tpu.vector_store %arg4[%c0_23, %c0_24, %c0_25], %72 {strides = array<i32>} : memref<1x64x128xf32, #tpu.memory_space<vmem>>, vector<1x64x128xf32>,
    return
  }
  func.func @transform_0(%arg0: i32) -> (i32, i32, i32) {
    %c0_i32 = arith.constant 0 : i32
    %c0_i32_0 = arith.constant 0 : i32
    %c0_i32_1 = arith.constant 0 : i32
    return %arg0, %c0_i32, %c0_i32_0 : i32, i32, i32
  }
  func.func @transform_1(%arg0: i32) -> (i32, i32) {
    %c0_i32 = arith.constant 0 : i32
    %c0_i32_0 = arith.constant 0 : i32
    %c0_i32_1 = arith.constant 0 : i32
    return %c0_i32, %c0_i32_0 : i32, i32
  }
  func.func @transform_2(%arg0: i32) -> (i32, i32) {
    %c0_i32 = arith.constant 0 : i32
    %c0_i32_0 = arith.constant 0 : i32
    %c0_i32_1 = arith.constant 0 : i32
    return %c0_i32, %c0_i32_0 : i32, i32
  }
  func.func @transform_3(%arg0: i32) -> (i32, i32, i32) {
    %c0_i32 = arith.constant 0 : i32
    %c0_i32_0 = arith.constant 0 : i32
    %c0_i32_1 = arith.constant 0 : i32
    return %arg0, %c0_i32, %c0_i32_0 : i32, i32, i32
  }
}

</mosaic_0001>

<bundles_post_ra>
// kernel: tpu_custom_call.1
= control target key start
LH: loop header
LB: loop body
LE: loop exit
PB: predicated region body
PF: predicated region fallthrough
CT: control target
= control target key end

     0   :  { %8 = vsyncpa [#allocation3], 0  ;;  %s4543_s0 = inlined_call_operand.hbm [shape: f32[2,16,64], index: 0, kind: input, shape index: {}]   ;;  %s4544_s1 = inlined_call_operand.hbm [shape: f32[16,384], index: 1, kind: input, shape index: {}]   ;;  %s4545_s2 = inlined_call_operand.hbm [shape: f32[128,128], index: 2, kind: input, shape index: {}]   ;;  %s4546_s3 = inlined_call_operand.hbm [shape: f32[2,64,128], index: 3, kind: output, shape index: {}]  }
   0x1   :  { %10 = vsyncpa [#allocation3 + $0x1], 0 }
   0x2   :  { %11 = vsyncpa [#allocation6], 0 }
   0x3   :  { %12 = vsyncpa [#allocation4], 0 }
   0x4   :  { %14 = vsyncpa [#allocation4 + $0x1], 0  ;;  %s3494_s12 = smov 0   ;;  %s3496_s13 = smov 0  }
   0x5   :  { %s3498_s14 = smov 0   ;;  %s3500_s15 = smov 0  }
   0x6 LB: > { %s3515_s16 = sadd.s32 4294967295, %s3458_s15   ;;  %s2467_s17 = sadd.s32 4294967294, %s3458_s15   ;;  %s3458_s15 = sphi %s3500_s15, %s4582_s15   ;;  %s3454_s14 = sphi %s3498_s14, %s4581_s14   ;;  %s3450_s13 = sphi %s3496_s13, %s4580_s13   ;;  %s3446_s12 = sphi %s3494_s12, %s4579_s12  }
   0x7   : > { %p40_p0 = scmp.ne.s32.totalorder %s3450_s13, %s3446_s12  ;;  %p4547_p1 = scmp.eq.s32.totalorder %s3515_s16, 0 }
   0x8   : > { %p112_p3 = scmp.eq.s32.totalorder %s2467_s17, 1  ;;  %p2468_p5 = scmp.ge.s32.totalorder %s3458_s15, 1 }
   0x9   : > { %p3524_p4 = por %p4547_p1, %p40_p0  ;;  %p119_p7 = scmp.lt.s32.totalorder %s3458_s15, 3 }
   0xa   : > { %p3529_p6 = por %p112_p3, %p40_p0  ;;  %s3460_s21 = smov [#allocation5]  }
   0xb   : > { %s4551_s18 = scalar_select %p3524_p4, 1, 0 }
   0xc   : > { %s4552_s19 = scalar_select %p3529_p6, 1, 0 }
   0xd   : > { %p3534_p8 = pnand %p2468_p5, %p119_p7  ;;  %s131_s22 = sshll.u32 %s3460_s21, 4  ;;  %s132_s22 = int_to_ptr.vmem [resolvable:$true] %s131_s22 }
   0xe   : > { %s3461_s24 = smov [#allocation7]   ;;  %s3321_s26 = scalar_lea.vmem %s132_s22, 768 }
   0xf   : > { %s4553_s20 = scalar_select %p3534_p8, 1, 0 }
  0x10   : > { %p3057_p9 = pneg %p3534_p8  ;;  %s144_s25 = sshll.u32 %s3461_s24, 4  ;;  %s145_s25 = int_to_ptr.vmem [resolvable:$true] %s144_s25 }
  0x11   : > { %p3322_p13 = scmp.ne.s32.totalorder %s132_s22, %s3321_s26  ;;  %p3329_p5 = scmp.lt.s32.totalorder %s132_s22, %s132_s22 }
  0x12   : > { %p3543_p11 = pnand %p3057_p9, %p4547_p1  ;;  %p3330_p7 = scmp.lt.s32.totalorder %s3321_s26, %s3321_s26 }
  0x14   : > { %p3312_p12 = pneg %p3543_p11  ;;  %p3331_p10 = por %p3330_p7, %p3329_p5 }
  0x16   : > { %p3324_p0 = pnand %p3322_p13, %p3312_p12 }
  0x18   : > { %p3325_p3 = pneg %p3324_p0 }
  0x1a   : > { %p3332_p9 = pnand %p3331_p10, %p3325_p3 }
  0x1c   : > { %3335 = shalt.err (!%p3332_p9)
}
  0x1d   : > { %s3462_s27 = smov 384   ;;  %s3463_s28 = smov 24  }
  0x1e   : > { %3060 = dma.hbm_to_vmem [thread:$0]  (!%p3543_p11), %s4544_s1, 768, %s132_s22, [#allocation6], %s3462_s27, %s3462_s27, %s3463_s28  }
  0x1f   : > { %s3347_s4 = scalar_lea.vmem %s145_s25, 2048  ;;  %p3355_p2 = scmp.lt.s32.totalorder %s145_s25, %s145_s25 }
  0x20   : > { %p3348_p1 = scmp.ne.s32.totalorder %s145_s25, %s3347_s4  ;;  %p3356_p6 = scmp.lt.s32.totalorder %s3347_s4, %s3347_s4 }
  0x22   : > { %p3350_p13 = pnand %p3348_p1, %p3312_p12  ;;  %p3357_p5 = por %p3356_p6, %p3355_p2 }
  0x24   : > { %p3351_p0 = pneg %p3350_p13 }
  0x26   : > { %p3358_p10 = pnand %p3357_p5, %p3351_p0 }
  0x28   : > { %3361 = shalt.err (!%p3358_p10)
}
  0x29   : > { %s3464_s5 = smov 128   ;;  %s3465_s6 = smov 8  }
  0x2a   : > { %3063 = dma.hbm_to_vmem [thread:$0]  (!%p3543_p11), %s4545_s2, 2048, %s145_s25, [#allocation6], %s3464_s5, %s3464_s5, %s3465_s6  }
  0x2b   : > { %s3569_s9 = sadd.s32 1, %s3458_s15   ;;  %s27_s11 = sadd.s32 1, %s3454_s14 }
  0x2c   : > { %s24_s10 = ssub.s32 %s3458_s15, %s3569_s9  ;;  %p34_p2 = scmp.ne.s32.totalorder %s3454_s14, %s3450_s13 }
  0x2d   : > { %p25_p1 = scmp.eq.s32.totalorder %s24_s10, 0  ;;  %p35_p6 = scmp.eq.s32.totalorder %s3458_s15, 0 }
  0x2e   : > { %p4555_p3 = scmp.eq.s32.totalorder %s3515_s16, 1  ;;  %p3074_p9 = scmp.lt.s32.totalorder %s3458_s15, 2 }
  0x2f   : > { %s3578_s17 = scalar_select %p25_p1, %s3454_s14, %s27_s11  }
  0x30   : > { %p36_p12 = por %p35_p6, %p34_p2  ;;  %p3582_p7 = por %p4555_p3, %p34_p2 }
  0x31   : > { %s158_s22 = sand.u32 1, %s3454_s14   ;;  %s2597_s24 = sshll.u32 %s3458_s15, 8 }
  0x32   : > { %s4556_s21 = scalar_select %p3582_p7, 1, 0 }
  0x33   : > { %s2472_s23 = sshll.u32 %s158_s22, 4  ;;  %s3592_s27 = scalar_lea.hbm %s4543_s0, %s2597_s24 }
  0x34   : > { %s162_s28 = scalar_lea.vmem [#allocation2], %s2472_s23  ;;  %p3596_p11 = pnand %p3074_p9, %p36_p12 }
  0x35   : > { %s169_s29 = sshll.u32 %s162_s28, 4  ;;  %s3600_s4 = scalar_lea.sflag [#allocation3], %s158_s22  ;;  %s3594_s29 = int_to_ptr.vmem [resolvable:$true] %s169_s29 }
  0x36   : > { %s3362_s7 = scalar_lea.hbm %s3592_s27, 256  ;;  %p3364_p0 = pneg %p3596_p11 }
  0x37   : > { %p3363_p13 = scmp.ne.s32.totalorder %s3592_s27, %s3362_s7  ;;  %s3367_s11 = scalar_lea.hbm %s4543_s0, 512 }
  0x38   : > { %p3368_p1 = scmp.lt.s32.totalorder %s3592_s27, %s4543_s0  ;;  %p3369_p2 = scmp.lt.s32.totalorder %s3367_s11, %s3362_s7 }
  0x39   : > { %p3365_p5 = pnand %p3364_p0, %p3363_p13 }
  0x3a   : > { %p3370_p6 = por %p3369_p2, %p3368_p1 }
  0x3b   : > { %p3366_p10 = pneg %p3365_p5 }
  0x3d   : > { %p3371_p12 = pnand %p3370_p6, %p3366_p10 }
  0x3f   : > { %3374 = shalt.err (!%p3371_p12)
}
  0x40   : > { %s3375_s22 = scalar_lea.vmem %s3594_s29, 256  ;;  %s3466_s25 = smov [#allocation2]  }
  0x41   : > { %p3376_p3 = scmp.ne.s32.totalorder %s3594_s29, %s3375_s22  ;;  %s3380_s26 = sshll.u32 %s3466_s25, 4  ;;  %s3381_s26 = int_to_ptr.vmem [resolvable:$false] %s3380_s26 }
  0x42   : > { %s3382_s28 = scalar_lea.vmem %s3381_s26, 512  ;;  %p3383_p5 = scmp.lt.s32.totalorder %s3594_s29, %s3381_s26 }
  0x43   : > { %p3378_p9 = pnand %p3376_p3, %p3364_p0  ;;  %p3384_p7 = scmp.lt.s32.totalorder %s3382_s28, %s3375_s22 }
  0x45   : > { %p3379_p13 = pneg %p3378_p9  ;;  %p3385_p4 = por %p3384_p7, %p3383_p5 }
  0x47   : > { %p3386_p8 = pnand %p3385_p4, %p3379_p13 }
  0x49   : > { %3389 = shalt.err (!%p3386_p8)
}
  0x4a   : > { %3067 = dma.hbm_to_vmem [thread:$0]  (!%p3596_p11), %s3592_s27, 256, %s3594_s29, %s3600_s4, %s3464_s5, %s3464_s5, %s3465_s6  }
  0x4b   : > { %p4558_p0 = scmp.ne.s32.totalorder %s4553_s20, 0 }
  0x4d   : > { %181 = sbr.rel (%p4558_p0) target bundleno = 2914 (0xb62), region = 32 }
  0x52   : > { %s3627_s7 = sand.u32 1, %s3450_s13   ;;  %p4559_p4 = scmp.ne.s32.totalorder %s4551_s18, 0 }
  0x53   : > { %s2476_s8 = sshll.u32 %s3627_s7, 4  ;;  %s184_s10 = scalar_lea.sflag [#allocation3], %s3627_s7 }
  0x54   : > { %s187_s11 = scalar_lea.vmem [#allocation2], %s2476_s8 }
  0x55   : > { %3433 = dma.done.wait (%p4559_p4), %s184_s10, 256  }
  0x56   : > { %3435 = vsyncadd (%p4559_p4), %s184_s10, 4294967040  ;;  %p4560_p8 = scmp.eq.s32.totalorder %s3515_s16, 0 }
  0x58   : > { %3437 = dma.done.wait (%p4560_p8), [#allocation6], 2816   ;;  %p4561_p7 = pmov %p4560_p8 }
  0x59   : > { %v3467_v0 = vmov 0.0   ;;  %v240_v1 = vld [vmem:[%s187_s11] sm:$0xff]  ;;  %v221_v3 = vld [vmem:[#allocation5 + $0x18] sm:$0xff]  ;;  %v219_v4 = vld [vmem:[#allocation5 + $0x8] sm:$0xff]  ;;  %vm274_vm0 = vcmask 130048   ;;  %vm517_vm1 = vcmask 261120  }
  0x5a   : > { %3439 = vsyncadd (%p4561_p7), [#allocation6], 4294964480  ;;  %363 = vmatprep.mubr.f32.mxu0 %v3467_v0  ;;  %v222_v2 = vld [vmem:[#allocation5 + $0x20] sm:$0xff]  ;;  %242 = vxpose.xlu0.b32.start [1/2] (short) (narrow) %v240_v1, 64  ;;  %v241_v6 = vld [vmem:[%s187_s11 + $0x8] sm:$0xff]  ;;  %vm671_vm2 = vcmask 523264  }
  0x5b   : > { %327 = vmatprep.subr.mxu0 %v222_v2  ;;  %v218_v5 = vld [vmem:[#allocation5] sm:$0xff]  ;;  %v223_v7 = vld [vmem:[#allocation5 + $0x28] sm:$0xff]  ;;  %v220_v8 = vld [vmem:[#allocation5 + $0x10] sm:$0xff]  ;;  %s3468_s18 = smov 96   ;;  %s3469_s20 = smov 64   ;;  %vm2239_vm3 = vcmask 785408  }
  0x5c   : > { %328 = vmatpush1.msra.mxu0 %v221_v3  ;;  %2761 = vmatprep.subr.mxu1 %v223_v7  ;;  %s3470_s5 = smov 32   ;;  %s2479_s6 = sshll.u32 %s3627_s7, 6 }
  0x5d   : > { %329 = vmatprep.subr.mxu0 %v219_v4  ;;  %2762 = vmatpush3.msra.mxu1 %v223_v7  ;;  %s217_s27 = scalar_lea.vmem [#allocation8], %s2479_s6  ;;  %s2598_s30 = sshll.u32 %s3515_s16, 10 }
  0x5e   : > { %330 = vmatpush1.msra.mxu0 %v218_v5  ;;  %243 = vxpose.xlu0.b32.end [2/2] (short) (narrow) %v241_v6, 64  ;;  %s2375_s29 = sshll.u32 %s217_s27, 4  ;;  %s4500_s24 = scalar_lea.hbm %s4546_s3, %s2598_s30  ;;  %s4495_s29 = int_to_ptr.vmem [resolvable:$true] %s2375_s29 }
  0x5f   : > { %2763 = vmatprep.subr.mxu1 %v220_v8  ;;  %s2362_s22 = scalar_lea.sflag [#allocation4], %s3627_s7  ;;  %s3390_s25 = scalar_lea.vmem %s4495_s29, 1024 }
  0x60   : > { %2764 = vmatpush3.msra.mxu1 %v220_v8  ;;  %p3391_p11 = scmp.ne.s32.totalorder %s4495_s29, %s3390_s25  ;;  %p4576_p10 = scmp.ne.s32.totalorder %s4556_s21, 0 }
  0x61   : > { %s3471_s16 = smov [#allocation8]  }
  0x62   : > { %p3392_p1 = pnand %p3391_p11, %p4576_p10  ;;  %s3394_s26 = sshll.u32 %s3471_s16, 4  ;;  %s3395_s26 = int_to_ptr.vmem [resolvable:$false] %s3394_s26 }
  0x63   : > { %s3396_s28 = scalar_lea.vmem %s3395_s26, 2048  ;;  %p3397_p6 = scmp.lt.s32.totalorder %s4495_s29, %s3395_s26 }
  0x64   : > { %p3393_p2 = pneg %p3392_p1  ;;  %p3398_p12 = scmp.lt.s32.totalorder %s3396_s28, %s3390_s25 }
  0x66   : > { %p3399_p3 = por %p3398_p12, %p3397_p6 }
  0x68   : > { %p3400_p9 = pnand %p3399_p3, %p3393_p2 }
  0xd6   : > { %v258_v9 = vpop.trf.xlu0 }
  0xd7   : > { %2480 = vmatmul.mubr.msk.f32.vlgmr.msra.gmra.mxu0 %vm274_vm0, %v258_v9  ;;  %2765 = vmatprep.mubr.msk.f32.mxu1 %vm274_vm0, %v258_v9 }
  0xd8   : > { %369 = vmatprep.mubr.f32.mxu0 %v3467_v0 }
  0xda   : > { %v259_v10 = vpop.trf.xlu0 }
  0xdb   : > { %2481 = vmatmul.mubr.msk.f32.gmra.mxu0 %vm274_vm0, %v259_v10  ;;  %2766 = vmatmul.mubr.msk.f32.vlgmr.msra.gmra.mxu1 %vm274_vm0, %v259_v10 }
  0xdc   : > { %375 = vmatprep.mubr.f32.mxu0 %v3467_v0 }
  0xde   : > { %v260_v11 = vpop.trf.xlu0 }
  0xdf   : > { %2482 = vmatmul.mubr.msk.f32.gmra.mxu0 %vm274_vm0, %v260_v11  ;;  %2768 = vmatprep.mubr.msk.f32.mxu1 %vm274_vm0, %v260_v11 }
  0xe0   : > { %381 = vmatprep.mubr.f32.mxu0 %v3467_v0 }
  0xe2   : > { %v261_v12 = vpop.trf.xlu0 }
  0xe3   : > { %2483 = vmatmul.mubr.msk.f32.gmra.mxu0 %vm274_vm0, %v261_v12  ;;  %2769 = vmatmul.mubr.msk.f32.gmra.mxu1 %vm274_vm0, %v261_v12 }
  0xe4   : > { %387 = vmatprep.mubr.f32.mxu0 %v3467_v0 }
  0xe6   : > { %v262_v13 = vpop.trf.xlu0 }
  0xe7   : > { %2484 = vmatmul.mubr.msk.f32.gmra.mxu0 %vm274_vm0, %v262_v13  ;;  %2771 = vmatprep.mubr.msk.f32.mxu1 %vm274_vm0, %v262_v13 }
  0xe8   : > { %393 = vmatprep.mubr.f32.mxu0 %v3467_v0 }
  0xea   : > { %v263_v14 = vpop.trf.xlu0 }
  0xeb   : > { %2485 = vmatmul.mubr.msk.f32.gmra.mxu0 %vm274_vm0, %v263_v14  ;;  %2772 = vmatmul.mubr.msk.f32.gmra.mxu1 %vm274_vm0, %v263_v14 }
  0xec   : > { %399 = vmatprep.mubr.f32.mxu0 %v3467_v0 }
  0xee   : > { %v264_v15 = vpop.trf.xlu0 }
  0xef   : > { %2486 = vmatmul.mubr.msk.f32.gmra.mxu0 %vm274_vm0, %v264_v15  ;;  %2774 = vmatprep.mubr.msk.f32.mxu1 %vm274_vm0, %v264_v15 }
  0xf0   : > { %405 = vmatprep.mubr.f32.mxu0 %v3467_v0 }
  0xf2   : > { %v265_v16 = vpop.trf.xlu0 }
  0xf3   : > { %2487 = vmatmul.mubr.msk.f32.gmra.mxu0 %vm274_vm0, %v265_v16  ;;  %2775 = vmatmul.mubr.msk.f32.gmra.mxu1 %vm274_vm0, %v265_v16 }
 0x197   : > { %v3655_v17 = vpop.f32.mrf.mxu0 }
 0x198   : > { %2793 = vmatprep.mubr.msk.f32.mxu0 %vm517_vm1, %v3655_v17 }
 0x199   : > { %v3659_v18 = vpop.f32.mrf.mxu0 }
 0x19b   : > { %v3661_v19 = vpop.f32.mrf.mxu0  ;;  %v3667_v22 = vpop.f32.mrf.mxu1 }
 0x19d   : > { %v3663_v20 = vpop.f32.mrf.mxu0  ;;  %v3673_v25 = vpop.f32.mrf.mxu1 }
 0x19f   : > { %v3665_v21 = vpop.f32.mrf.mxu0 }
 0x1a1   : > { %v3669_v23 = vpop.f32.mrf.mxu0 }
 0x1a3   : > { %v3671_v24 = vpop.f32.mrf.mxu0  ;;  %v3677_v27 = vpop.f32.mrf.mxu1 }
 0x1a5   : > { %v3675_v26 = vpop.f32.mrf.mxu0  ;;  %v3683_v30 = vpop.f32.mrf.mxu1 }
 0x1a7   : > { %v3679_v28 = vpop.f32.mrf.mxu0 }
 0x1a9   : > { %v3681_v29 = vpop.f32.mrf.mxu0 }
 0x1ab   : > { %v3685_v31 = vpop.f32.mrf.mxu0  ;;  %v3687_v32 = vpop.f32.mrf.mxu1 }
 0x1ad   : > { %v3689_v33 = vpop.f32.mrf.mxu0  ;;  %v3693_v35 = vpop.f32.mrf.mxu1 }
 0x1af   : > { %v3691_v34 = vpop.f32.mrf.mxu0 }
 0x1b1   : > { %v3695_v36 = vpop.f32.mrf.mxu0 }
 0x1b3   : > { %v3697_v37 = vpop.f32.mrf.mxu0  ;;  %v3699_v38 = vpop.f32.mrf.mxu1 }
 0x1b4   : > { %2805 = vmatprep.subr.mxu1 %v3699_v38 }
 0x1b5   : > { %v3702_v39 = vpop.f32.mrf.mxu0  ;;  %v3704_v40 = vpop.f32.mrf.mxu1  ;;  %2806 = vmatpush3.msra.mxu1 %v3699_v38 }
 0x1b6   : > { %2777 = vmatprep.subr.msk.mxu0 %vm517_vm1, %v3702_v39  ;;  %2807 = vmatprep.subr.mxu1 %v3704_v40 }
 0x1b7   : > { %2778 = vmatpush3.xpose.msk.msra.mxu0 %vm517_vm1, %v3702_v39  ;;  %2808 = vmatpush3.msra.mxu1 %v3704_v40 }
 0x1b8   : > { %2779 = vmatprep.subr.msk.mxu0 %vm517_vm1, %v3695_v36  ;;  %2809 = vmatprep.subr.mxu1 %v3687_v32 }
 0x1b9   : > { %2810 = vmatpush3.msra.mxu1 %v3687_v32 }
 0x1ba   : > { %2811 = vmatprep.subr.mxu1 %v3693_v35 }
 0x1bb   : > { %2780 = vmatpush3.xpose.msk.msra.mxu0 %vm517_vm1, %v3695_v36  ;;  %2812 = vmatpush3.msra.mxu1 %v3693_v35 }
 0x1bc   : > { %2781 = vmatprep.subr.msk.mxu0 %vm517_vm1, %v3689_v33  ;;  %2813 = vmatprep.subr.mxu1 %v3677_v27 }
 0x1bd   : > { %2814 = vmatpush3.msra.mxu1 %v3677_v27 }
 0x1be   : > { %2815 = vmatprep.subr.mxu1 %v3683_v30 }
 0x1bf   : > { %2782 = vmatpush3.xpose.msk.msra.mxu0 %vm517_vm1, %v3689_v33  ;;  %2816 = vmatpush3.msra.mxu1 %v3683_v30 }
 0x1c0   : > { %2783 = vmatprep.subr.msk.mxu0 %vm517_vm1, %v3681_v29  ;;  %2817 = vmatprep.subr.mxu1 %v3667_v22 }
 0x1c1   : > { %2818 = vmatpush3.msra.mxu1 %v3667_v22 }
 0x1c2   : > { %2819 = vmatprep.subr.mxu1 %v3673_v25 }
 0x1c3   : > { %2784 = vmatpush3.xpose.msk.msra.mxu0 %vm517_vm1, %v3681_v29  ;;  %2820 = vmatpush3.msra.mxu1 %v3673_v25 }
 0x1c4   : > { %2785 = vmatprep.subr.msk.mxu0 %vm517_vm1, %v3675_v26 }
 0x1c7   : > { %2786 = vmatpush3.xpose.msk.msra.mxu0 %vm517_vm1, %v3675_v26 }
 0x1c8   : > { %2787 = vmatprep.subr.msk.mxu0 %vm517_vm1, %v3669_v23 }
 0x1cb   : > { %2788 = vmatpush3.xpose.msk.msra.mxu0 %vm517_vm1, %v3669_v23 }
 0x1cc   : > { %2789 = vmatprep.subr.msk.mxu0 %vm517_vm1, %v3663_v20 }
 0x1cf   : > { %2790 = vmatpush3.xpose.msk.msra.mxu0 %vm517_vm1, %v3663_v20 }
 0x1d0   : > { %2791 = vmatprep.subr.msk.mxu0 %vm517_vm1, %v3659_v18 }
 0x1d3   : > { %2792 = vmatpush3.xpose.msk.msra.mxu0 %vm517_vm1, %v3659_v18 }
 0x1d6   : > { %2794 = vmatmul.mubr.msk.f32.vlgmr.msra.gmra.mxu0 %vm517_vm1, %v3661_v19 }
 0x1d7   : > { %2796 = vmatprep.mubr.msk.f32.mxu0 %vm517_vm1, %v3665_v21 }
 0x1da   : > { %2797 = vmatmul.mubr.msk.f32.gmra.mxu0 %vm517_vm1, %v3671_v24 }
 0x1db   : > { %2799 = vmatprep.mubr.msk.f32.mxu0 %vm517_vm1, %v3679_v28 }
 0x1de   : > { %2800 = vmatmul.mubr.msk.f32.gmra.mxu0 %vm517_vm1, %v3685_v31 }
 0x1df   : > { %2802 = vmatprep.mubr.msk.f32.mxu0 %vm517_vm1, %v3691_v34 }
 0x1e2   : > { %2803 = vmatmul.mubr.msk.f32.gmra.mxu0 %vm517_vm1, %v3697_v37 }
 0x296   : > { %v2795_v41 = vpop.f32.mrf.mxu0 }
 0x297   : > { %v675_v42 = vsel %vm671_vm2, %v2795_v41, -inf }
 0x298   : > { %676 = vmax.xlane.f32.xlu1 %v675_v42  ;;  %v632_v43 = vpop.f32.mrf.mxu0 }
 0x299   : > { %v672_v45 = vsel %vm671_vm2, %v632_v43, -inf }
 0x29a   : > { %v2798_v44 = vpop.f32.mrf.mxu0 }
 0x29b   : > { %v681_v48 = vsel %vm671_vm2, %v2798_v44, -inf }
 0x29c   : > { %673 = vmax.xlane.f32.xlu1 %v672_v45  ;;  %v642_v46 = vpop.f32.mrf.mxu0 }
 0x29d   : > { %v678_v47 = vsel %vm671_vm2, %v642_v46, -inf }
 0x29e   : > { %679 = vmax.xlane.f32.xlu0 %v678_v47  ;;  %v3813_v49 = vpop.f32.mrf.mxu0 }
 0x29f   : > { %v687_v50 = vsel %vm671_vm2, %v3813_v49, -inf }
 0x2a0   : > { %682 = vmax.xlane.f32.xlu1 %v681_v48  ;;  %v3817_v51 = vpop.f32.mrf.mxu0 }
 0x2a1   : > { %v684_v52 = vsel %vm671_vm2, %v3817_v51, -inf }
 0x2a2   : > { %v3821_v53 = vpop.f32.mrf.mxu0 }
 0x2a3   : > { %v693_v54 = vsel %vm671_vm2, %v3821_v53, -inf }
 0x2a4   : > { %v3825_v55 = vpop.f32.mrf.mxu0 }
 0x2a5   : > { %v690_v56 = vsel %vm671_vm2, %v3825_v55, -inf }
 0x2b1   : > { %919 = vrot.lane.b32.xlu1 %v3702_v39, %s3468_s18 }
 0x2b4   : > { %917 = vrot.lane.b32.xlu0 %v3695_v36, %s3468_s18 }
 0x2b5   : > { %915 = vrot.lane.b32.xlu1 %v3689_v33, %s3468_s18 }
 0x2b8   : > { %907 = vrot.lane.b32.xlu0 %v3663_v20, %s3468_s18 }
 0x2b9   : > { %913 = vrot.lane.b32.xlu1 %v3681_v29, %s3468_s18 }
 0x2bc   : > { %905 = vrot.lane.b32.xlu0 %v3659_v18, %s3468_s18 }
 0x2bd   : > { %911 = vrot.lane.b32.xlu1 %v3675_v26, %s3468_s18 }
 0x2c0   : > { %889 = vrot.lane.b32.xlu0 %v3655_v17, %s3468_s18 }
 0x2c1   : > { %1337 = vrot.lane.b32.xlu1 %v3702_v39, %s3469_s20 }
 0x2c4   : > { %1329 = vrot.lane.b32.xlu0 %v3675_v26, %s3469_s20 }
 0x2c5   : > { %909 = vrot.lane.b32.xlu1 %v3669_v23, %s3468_s18 }
 0x2c8   : > { %895 = vrot.lane.b32.xlu0 %v3671_v24, %s3468_s18 }
 0x2c9   : > { %1335 = vrot.lane.b32.xlu1 %v3695_v36, %s3469_s20 }
 0x2cc   : > { %897 = vrot.lane.b32.xlu0 %v3679_v28, %s3468_s18 }
 0x2cd   : > { %1333 = vrot.lane.b32.xlu1 %v3689_v33, %s3469_s20 }
 0x2d0   : > { %1325 = vrot.lane.b32.xlu0 %v3663_v20, %s3469_s20 }
 0x2d4   : > { %903 = vrot.lane.b32.xlu0 %v3697_v37, %s3468_s18 }
 0x2d8   : > { %1307 = vrot.lane.b32.xlu0 %v3655_v17, %s3469_s20 }
 0x2dc   : > { %1311 = vrot.lane.b32.xlu0 %v3665_v21, %s3469_s20 }
 0x2e0   : > { %1315 = vrot.lane.b32.xlu0 %v3679_v28, %s3469_s20 }
 0x2e4   : > { %1319 = vrot.lane.b32.xlu0 %v3691_v34, %s3469_s20 }
 0x2f1   : > { %688 = vmax.xlane.f32.xlu1 %v687_v50 }
 0x2f5   : > { %685 = vmax.xlane.f32.xlu1 %v684_v52 }
 0x2f9   : > { %694 = vmax.xlane.f32.xlu1 %v693_v54 }
 0x2fd   : > { %691 = vmax.xlane.f32.xlu1 %v690_v56 }
 0x30e   : > { %1331 = vrot.lane.b32.xlu1 %v3681_v29, %s3469_s20 }
 0x312   : > { %891 = vrot.lane.b32.xlu1 %v3661_v19, %s3468_s18 }
 0x316   : > { %893 = vrot.lane.b32.xlu1 %v3665_v21, %s3468_s18 }
 0x321   : > { %v677_v57 = vpop.xlane.xlu1 %676 }
 0x322   : > { %v697_v58 = vsub.f32 %v2795_v41, %v677_v57 }
 0x324   : > { %v706_v59 = vmul.f32 1.442695, %v697_v58 }
 0x325   : > { %v674_v60 = vpop.xlane.xlu1 %673 }
 0x326   : > { %v696_v61 = vsub.f32 %v632_v43, %v674_v60  ;;  %3182 = vpow2.f32 %v706_v59 }
 0x327   : > { %v680_v62 = vpop.xlane.xlu0 %679 }
 0x328   : > { %v704_v63 = vmul.f32 1.442695, %v696_v61  ;;  %v698_v3 = vsub.f32 %v642_v46, %v680_v62 }
 0x329   : > { %v683_v0 = vpop.xlane.xlu1 %682 }
 0x32a   : > { %v699_v1 = vsub.f32 %v2798_v44, %v683_v0  ;;  %3184 = vpow2.f32 %v704_v63  ;;  %v708_v7 = vmul.f32 1.442695, %v698_v3 }
 0x32b   : > { %v3835_v2 = vpop.permute.xlu0 %917 }
 0x32c   : > { %v710_v4 = vmul.f32 1.442695, %v699_v1 }
 0x32d   : > { %v3837_v5 = vpop.permute.xlu1 %919 }
 0x32e   : > { %2833 = vmatprep.subr.msk.mxu1 %vm517_vm1, %v3837_v5  ;;  %3186 = vpow2.f32 %v710_v4 }
 0x32f   : > { %v3841_v6 = vpop.permute.xlu0 %907  ;;  %3188 = vpow2.f32 %v708_v7 }
 0x331   : > { %v3843_v8 = vpop.permute.xlu1 %915 }
 0x333   : > { %v3845_v9 = vpop.permute.xlu0 %905  ;;  %v3849_v11 = vpop.eup %3182 }
 0x334   : > { %v723_v14 = vsel %vm671_vm2, %v3849_v11, 0.0 }
 0x335   : > { %v3847_v10 = vpop.permute.xlu1 %913 }
 0x337   : > { %v3851_v12 = vpop.permute.xlu0 %889  ;;  %v3857_v15 = vpop.eup %3184 }
 0x338   : > { %v720_v42 = vsel %vm671_vm2, %v3857_v15, 0.0 }
 0x339   : > { %v3853_v13 = vpop.permute.xlu1 %911 }
 0x33a   : > { %724 = vadd.xlane.f32.xlu1 %v723_v14 }
 0x33b   : > { %v1330_v16 = vpop.permute.xlu0 %1329  ;;  %v3861_v43 = vpop.eup %3186 }
 0x33c   : > { %v729_v46 = vsel %vm671_vm2, %v3861_v43, 0.0  ;;  %v3871_v47 = vpop.eup %3188 }
 0x33d   : > { %v1338_v41 = vpop.permute.xlu1 %1337  ;;  %v726_v52 = vsel %vm671_vm2, %v3871_v47, 0.0 }
 0x33e   : > { %2889 = vmatprep.subr.msk.mxu0 %vm517_vm1, %v1338_v41  ;;  %721 = vadd.xlane.f32.xlu1 %v720_v42 }
 0x33f   : > { %2890 = vmatpush3.xpose.msk.msra.mxu0 %vm517_vm1, %v1338_v41  ;;  %v3865_v44 = vpop.permute.xlu0 %895 }
 0x341   : > { %v3867_v45 = vpop.permute.xlu1 %909 }
 0x342   : > { %730 = vadd.xlane.f32.xlu1 %v729_v46 }
 0x343   : > { %v3873_v48 = vpop.permute.xlu0 %897 }
 0x345   : > { %v1336_v50 = vpop.permute.xlu1 %1335 }
 0x346   : > { %2891 = vmatprep.subr.msk.mxu0 %vm517_vm1, %v1336_v50  ;;  %727 = vadd.xlane.f32.xlu1 %v726_v52 }
 0x347   : > { %2892 = vmatpush3.xpose.msk.msra.mxu0 %vm517_vm1, %v1336_v50  ;;  %v3879_v54 = vpop.permute.xlu0 %1325 }
 0x349   : > { %v1334_v56 = vpop.permute.xlu1 %1333 }
 0x34a   : > { %2893 = vmatprep.subr.msk.mxu0 %vm517_vm1, %v1334_v56 }
 0x34b   : > { %2894 = vmatpush3.xpose.msk.msra.mxu0 %vm517_vm1, %v1334_v56  ;;  %v3883_v57 = vpop.permute.xlu0 %903 }
 0x34f   : > { %v1308_v58 = vpop.permute.xlu0 %1307 }
 0x350   : > { %2905 = vmatprep.mubr.msk.f32.mxu0 %vm517_vm1, %v1308_v58 }
 0x37a   : > { %v689_v59 = vpop.xlane.xlu1 %688 }
 0x37b   : > { %v701_v60 = vsub.f32 %v3813_v49, %v689_v59 }
 0x37d   : > { %v714_v61 = vmul.f32 1.442695, %v701_v60 }
 0x37e   : > { %v686_v62 = vpop.xlane.xlu1 %685 }
 0x37f   : > { %3190 = vpow2.f32 %v714_v61  ;;  %v700_v63 = vsub.f32 %v3817_v51, %v686_v62 }
 0x381   : > { %v712_v0 = vmul.f32 1.442695, %v700_v63 }
 0x382   : > { %v695_v1 = vpop.xlane.xlu1 %694 }
 0x383   : > { %3192 = vpow2.f32 %v712_v0  ;;  %v703_v3 = vsub.f32 %v3821_v53, %v695_v1 }
 0x385   : > { %v718_v4 = vmul.f32 1.442695, %v703_v3 }
 0x386   : > { %v692_v7 = vpop.xlane.xlu1 %691 }
 0x387   : > { %3194 = vpow2.f32 %v718_v4  ;;  %v702_v14 = vsub.f32 %v3825_v55, %v692_v7 }
 0x389   : > { %v716_v41 = vmul.f32 1.442695, %v702_v14 }
 0x38a   : > { %v1332_v42 = vpop.permute.xlu1 %1331 }
 0x38b   : > { %3196 = vpow2.f32 %v716_v41  ;;  %2895 = vmatprep.subr.msk.mxu0 %vm517_vm1, %v1332_v42 }
 0x38c   : > { %v3891_v49 = vpop.eup %3190  ;;  %2896 = vmatpush3.xpose.msk.msra.mxu0 %vm517_vm1, %v1332_v42 }
 0x38d   : > { %2897 = vmatprep.subr.msk.mxu0 %vm517_vm1, %v1330_v16  ;;  %v735_v51 = vsel %vm671_vm2, %v3891_v49, 0.0 }
 0x38e   : > { %736 = vadd.xlane.f32.xlu1 %v735_v51 }
 0x390   : > { %v3897_v53 = vpop.eup %3192  ;;  %2898 = vmatpush3.xpose.msk.msra.mxu0 %vm517_vm1, %v1330_v16  ;;  %v3918_v16 = vpop.permute.xlu1 %891 }
 0x391   : > { %v732_v55 = vsel %vm671_vm2, %v3897_v53, 0.0 }
 0x392   : > { %733 = vadd.xlane.f32.xlu1 %v732_v55 }
 0x394   : > { %v3902_v46 = vpop.eup %3194  ;;  %v3922_v58 = vpop.permute.xlu1 %893 }
 0x395   : > { %v741_v50 = vsel %vm671_vm2, %v3902_v46, 0.0 }
 0x396   : > { %742 = vadd.xlane.f32.xlu1 %v741_v50 }
 0x398   : > { %v3906_v52 = vpop.eup %3196 }
 0x399   : > { %v738_v56 = vsel %vm671_vm2, %v3906_v52, 0.0 }
 0x39a   : > { %739 = vadd.xlane.f32.xlu1 %v738_v56  ;;  %v1312_v56 = vpop.permute.xlu0 %1311 }
 0x3ab   : > { %1327 = vrot.lane.b32.xlu1 %v3669_v23, %s3469_s20 }
 0x3af   : > { %899 = vrot.lane.b32.xlu1 %v3685_v31, %s3468_s18 }
 0x3b3   : > { %901 = vrot.lane.b32.xlu1 %v3691_v34, %s3468_s18 }
 0x3b7   : > { %1323 = vrot.lane.b32.xlu1 %v3659_v18, %s3469_s20 }
 0x3bb   : > { %1309 = vrot.lane.b32.xlu1 %v3661_v19, %s3469_s20 }
 0x3bf   : > { %1313 = vrot.lane.b32.xlu1 %v3671_v24, %s3469_s20 }
 0x3c3   : > { %1317 = vrot.lane.b32.xlu1 %v3685_v31, %s3469_s20  ;;  %v725_v59 = vpop.xlane.xlu1 %724 }
 0x3c4   : > { %3198 = vrcp.f32 %v725_v59 }
 0x3c7   : > { %1321 = vrot.lane.b32.xlu1 %v3697_v37, %s3469_s20  ;;  %v722_v60 = vpop.xlane.xlu1 %721 }
 0x3c8   : > { %3200 = vrcp.f32 %v722_v60 }
 0x3cb   : > { %v731_v61 = vpop.xlane.xlu1 %730 }
 0x3cc   : > { %3202 = vrcp.f32 %v731_v61 }
 0x3cf   : > { %v728_v62 = vpop.xlane.xlu1 %727 }
 0x3d0   : > { %3204 = vrcp.f32 %v728_v62 }
 0x3d1   : > { %v3199_v63 = vpop.eup %3198 }
 0x3d2   : > { %v753_v3 = vmul.f32 %v3199_v63, %v3849_v11 }
 0x3d5   : > { %v3201_v0 = vpop.eup %3200 }
 0x3d6   : > { %v752_v1 = vmul.f32 %v3201_v0, %v3857_v15 }
 0x3d8   : > { %2821 = vmatprep.mubr.msk.f32.mxu1 %vm671_vm2, %v752_v1 }
 0x3d9   : > { %2822 = vmatmul.mubr.msk.f32.vlgmr.msra.gmra.mxu1 %vm671_vm2, %v753_v3  ;;  %v3203_v4 = vpop.eup %3202 }
 0x3da   : > { %2834 = vmatpush3.xpose.msk.msra.mxu1 %vm517_vm1, %v3837_v5  ;;  %v755_v11 = vmul.f32 %v3203_v4, %v3861_v43 }
 0x3db   : > { %2835 = vmatprep.subr.msk.mxu1 %vm517_vm1, %v3835_v2 }
 0x3dd   : > { %v3205_v7 = vpop.eup %3204 }
 0x3de   : > { %2836 = vmatpush3.xpose.msk.msra.mxu1 %vm517_vm1, %v3835_v2  ;;  %v754_v14 = vmul.f32 %v3205_v7, %v3871_v47 }
 0x3df   : > { %2837 = vmatprep.subr.msk.mxu1 %vm517_vm1, %v3843_v8 }
 0x3e0   : > { %2824 = vmatprep.mubr.msk.f32.mxu1 %vm671_vm2, %v754_v14 }
 0x3e1   : > { %2825 = vmatmul.mubr.msk.f32.gmra.mxu1 %vm671_vm2, %v755_v11 }
 0x3e2   : > { %2838 = vmatpush3.xpose.msk.msra.mxu1 %vm517_vm1, %v3843_v8 }
 0x3e3   : > { %2839 = vmatprep.subr.msk.mxu1 %vm517_vm1, %v3847_v10 }
 0x3e6   : > { %2840 = vmatpush3.xpose.msk.msra.mxu1 %vm517_vm1, %v3847_v10 }
 0x3e7   : > { %2841 = vmatprep.subr.msk.mxu1 %vm517_vm1, %v3853_v13 }
 0x3ea   : > { %2842 = vmatpush3.xpose.msk.msra.mxu1 %vm517_vm1, %v3853_v13 }
 0x3eb   : > { %2843 = vmatprep.subr.msk.mxu1 %vm517_vm1, %v3867_v45 }
 0x3ee   : > { %2844 = vmatpush3.xpose.msk.msra.mxu1 %vm517_vm1, %v3867_v45 }
 0x3ef   : > { %2845 = vmatprep.subr.msk.mxu1 %vm517_vm1, %v3841_v6 }
 0x3f2   : > { %2846 = vmatpush3.xpose.msk.msra.mxu1 %vm517_vm1, %v3841_v6 }
 0x3f3   : > { %2847 = vmatprep.subr.msk.mxu1 %vm517_vm1, %v3845_v9 }
 0x3f6   : > { %2848 = vmatpush3.xpose.msk.msra.mxu1 %vm517_vm1, %v3845_v9 }
 0x417   : > { %v737_v2 = vpop.xlane.xlu1 %736 }
 0x418   : > { %3206 = vrcp.f32 %v737_v2 }
 0x41b   : > { %v734_v5 = vpop.xlane.xlu1 %733 }
 0x41c   : > { %3208 = vrcp.f32 %v734_v5 }
 0x41f   : > { %v743_v8 = vpop.xlane.xlu1 %742 }
 0x420   : > { %3210 = vrcp.f32 %v743_v8 }
 0x423   : > { %v740_v10 = vpop.xlane.xlu1 %739 }
 0x424   : > { %3212 = vrcp.f32 %v740_v10 }
 0x425   : > { %v3207_v15 = vpop.eup %3206 }
 0x426   : > { %v757_v45 = vmul.f32 %v3207_v15, %v3891_v49  ;;  %v1316_v49 = vpop.permute.xlu0 %1315 }
 0x427   : > { %v1328_v13 = vpop.permute.xlu1 %1327 }
 0x428   : > { %2899 = vmatprep.subr.msk.mxu0 %vm517_vm1, %v1328_v13 }
 0x429   : > { %v3209_v43 = vpop.eup %3208  ;;  %2900 = vmatpush3.xpose.msk.msra.mxu0 %vm517_vm1, %v1328_v13 }
 0x42a   : > { %2901 = vmatprep.subr.msk.mxu0 %vm517_vm1, %v3879_v54  ;;  %v756_v6 = vmul.f32 %v3209_v43, %v3897_v53 }
 0x42b   : > { %v900_v9 = vpop.permute.xlu1 %899 }
 0x42c   : > { %2827 = vmatprep.mubr.msk.f32.mxu1 %vm671_vm2, %v756_v6 }
 0x42d   : > { %2828 = vmatmul.mubr.msk.f32.gmra.mxu1 %vm671_vm2, %v757_v45  ;;  %2902 = vmatpush3.xpose.msk.msra.mxu0 %vm517_vm1, %v3879_v54  ;;  %v3211_v41 = vpop.eup %3210 }
 0x42e   : > { %v759_v50 = vmul.f32 %v3211_v41, %v3902_v46  ;;  %v1320_v46 = vpop.permute.xlu0 %1319 }
 0x42f   : > { %v902_v47 = vpop.permute.xlu1 %901 }
 0x431   : > { %v3213_v42 = vpop.eup %3212 }
 0x432   : > { %v758_v51 = vmul.f32 %v3213_v42, %v3906_v52 }
 0x433   : > { %v1324_v55 = vpop.permute.xlu1 %1323 }
 0x434   : > { %2830 = vmatprep.mubr.msk.f32.mxu1 %vm671_vm2, %v758_v51  ;;  %2903 = vmatprep.subr.msk.mxu0 %vm517_vm1, %v1324_v55 }
 0x435   : > { %2831 = vmatmul.mubr.msk.f32.gmra.mxu1 %vm671_vm2, %v759_v50  ;;  %2904 = vmatpush3.xpose.msk.msra.mxu0 %vm517_vm1, %v1324_v55 }
 0x436   : > { %2849 = vmatprep.mubr.msk.f32.mxu1 %vm517_vm1, %v3851_v12 }
 0x437   : > { %v1310_v54 = vpop.permute.xlu1 %1309 }
 0x438   : > { %2906 = vmatmul.mubr.msk.f32.vlgmr.msra.gmra.mxu0 %vm517_vm1, %v1310_v54 }
 0x439   : > { %2850 = vmatmul.mubr.msk.f32.vlgmr.msra.gmra.mxu1 %vm517_vm1, %v3918_v16  ;;  %2908 = vmatprep.mubr.msk.f32.mxu0 %vm517_vm1, %v1312_v56 }
 0x43a   : > { %2852 = vmatprep.mubr.msk.f32.mxu1 %vm517_vm1, %v3922_v58 }
 0x43b   : > { %v1314_v53 = vpop.permute.xlu1 %1313 }
 0x43c   : > { %2909 = vmatmul.mubr.msk.f32.gmra.mxu0 %vm517_vm1, %v1314_v53 }
 0x43d   : > { %2853 = vmatmul.mubr.msk.f32.gmra.mxu1 %vm517_vm1, %v3865_v44  ;;  %2911 = vmatprep.mubr.msk.f32.mxu0 %vm517_vm1, %v1316_v49 }
 0x43e   : > { %2855 = vmatprep.mubr.msk.f32.mxu1 %vm517_vm1, %v3873_v48 }
 0x43f   : > { %v1318_v12 = vpop.permute.xlu1 %1317 }
 0x440   : > { %2912 = vmatmul.mubr.msk.f32.gmra.mxu0 %vm517_vm1, %v1318_v12 }
 0x441   : > { %2856 = vmatmul.mubr.msk.f32.gmra.mxu1 %vm517_vm1, %v900_v9  ;;  %2914 = vmatprep.mubr.msk.f32.mxu0 %vm517_vm1, %v1320_v46 }
 0x442   : > { %2858 = vmatprep.mubr.msk.f32.mxu1 %vm517_vm1, %v902_v47 }
 0x443   : > { %v1322_v52 = vpop.permute.xlu1 %1321 }
 0x444   : > { %2915 = vmatmul.mubr.msk.f32.gmra.mxu0 %vm517_vm1, %v1322_v52 }
 0x445   : > { %2859 = vmatmul.mubr.msk.f32.gmra.mxu1 %vm517_vm1, %v3883_v57 }
 0x499   : > { %v4049_v11 = vpop.f32.mrf.mxu1 }
 0x49b   : > { %v4051_v2 = vpop.f32.mrf.mxu1 }
 0x49c   : > { %4562 = vst [vmem:[#allocation12_spill] sm:$0xff] %v4051_v2 }
 0x4a1   : > { %v4053_v5 = vpop.f32.mrf.mxu1 }
 0x4a2   : > { %4563 = vst [vmem:[#allocation13_spill] sm:$0xff] %v4053_v5 }
 0x4a3   : > { %v4055_v8 = vpop.f32.mrf.mxu1 }
 0x4a4   : > { %4564 = vst [vmem:[#allocation14_spill] sm:$0xff] %v4055_v8 }
 0x4ed   : > { %v4057_v10 = vpop.f32.mrf.mxu1 }
 0x4ee   : > { %4565 = vst [vmem:[#allocation15_spill] sm:$0xff] %v4057_v10 }
 0x4ef   : > { %v4059_v13 = vpop.f32.mrf.mxu1 }
 0x4f0   : > { %4566 = vst [vmem:[#allocation16_spill] sm:$0xff] %v4059_v13 }
 0x4f5   : > { %v4061_v15 = vpop.f32.mrf.mxu1 }
 0x4f6   : > { %4567 = vst [vmem:[#allocation17_spill] sm:$0xff] %v4061_v15 }
 0x4f7   : > { %v4063_v9 = vpop.f32.mrf.mxu1 }
 0x4f8   : > { %v2907_v44 = vpop.f32.mrf.mxu0  ;;  %4568 = vst [vmem:[#allocation18_spill] sm:$0xff] %v4063_v9 }
 0x4f9   : > { %v1479_v16 = vsel %vm671_vm2, %v2907_v44, -inf  ;;  %v4065_v50 = vpop.f32.mrf.mxu1 }
 0x4fa   : > { %1480 = vmax.xlane.f32.xlu0 %v1479_v16  ;;  %v1437_v48 = vpop.f32.mrf.mxu0 }
 0x4fb   : > { %v1476_v58 = vsel %vm671_vm2, %v1437_v48, -inf  ;;  %v4069_v46 = vpop.f32.mrf.mxu1 }
 0x4fc   : > { %1477 = vmax.xlane.f32.xlu1 %v1476_v58  ;;  %v2910_v59 = vpop.f32.mrf.mxu0 }
 0x4fd   : > { %v1485_v60 = vsel %vm671_vm2, %v2910_v59, -inf  ;;  %v4075_v16 = vpop.f32.mrf.mxu1 }
 0x4fe   : > { %1486 = vmax.xlane.f32.xlu0 %v1485_v60  ;;  %v1447_v61 = vpop.f32.mrf.mxu0 }
 0x4ff   : > { %v1482_v62 = vsel %vm671_vm2, %v1447_v61, -inf  ;;  %v4081_v60 = vpop.f32.mrf.mxu1 }
 0x500   : > { %1483 = vmax.xlane.f32.xlu1 %v1482_v62  ;;  %v4009_v63 = vpop.f32.mrf.mxu0 }
 0x501   : > { %v1491_v57 = vsel %vm671_vm2, %v4009_v63, -inf }
 0x502   : > { %1492 = vmax.xlane.f32.xlu0 %v1491_v57  ;;  %v4013_v0 = vpop.f32.mrf.mxu0 }
 0x503   : > { %v1488_v1 = vsel %vm671_vm2, %v4013_v0, -inf }
 0x504   : > { %1489 = vmax.xlane.f32.xlu1 %v1488_v1  ;;  %v4017_v3 = vpop.f32.mrf.mxu0 }
 0x505   : > { %v1497_v4 = vsel %vm671_vm2, %v4017_v3, -inf }
 0x506   : > { %1498 = vmax.xlane.f32.xlu0 %v1497_v4  ;;  %v4021_v7 = vpop.f32.mrf.mxu0 }
 0x507   : > { %v1494_v14 = vsel %vm671_vm2, %v4021_v7, -inf }
 0x508   : > { %1495 = vmax.xlane.f32.xlu1 %v1494_v14 }
 0x519   : > { %1166 = vrot.lane.b32.xlu1 %v3704_v40, %s3468_s18 }
 0x51c   : > { %1168 = vrot.lane.b32.xlu0 %v3699_v38, %s3468_s18 }
 0x51d   : > { %1160 = vrot.lane.b32.xlu1 %v3677_v27, %s3468_s18 }
 0x520   : > { %1164 = vrot.lane.b32.xlu0 %v3687_v32, %s3468_s18 }
 0x521   : > { %1158 = vrot.lane.b32.xlu1 %v3683_v30, %s3468_s18 }
 0x524   : > { %1162 = vrot.lane.b32.xlu0 %v3693_v35, %s3468_s18 }
 0x525   : > { %1154 = vrot.lane.b32.xlu1 %v3673_v25, %s3468_s18 }
 0x528   : > { %1156 = vrot.lane.b32.xlu0 %v3667_v22, %s3468_s18 }
 0x529   : > { %1576 = vrot.lane.b32.xlu1 %v3704_v40, %s3469_s20 }
 0x52c   : > { %1578 = vrot.lane.b32.xlu0 %v3699_v38, %s3469_s20 }
 0x52d   : > { %1572 = vrot.lane.b32.xlu1 %v3693_v35, %s3469_s20 }
 0x530   : > { %1574 = vrot.lane.b32.xlu0 %v3687_v32, %s3469_s20 }
 0x583   : > { %v1481_v43 = vpop.xlane.xlu0 %1480 }
 0x584   : > { %v1501_v6 = vsub.f32 %v2907_v44, %v1481_v43  ;;  %v4091_v43 = vpop.f32.mrf.mxu1 }
 0x585   : > { %v1478_v45 = vpop.xlane.xlu1 %1477 }
 0x586   : > { %v1510_v47 = vmul.f32 1.442695, %v1501_v6  ;;  %v1500_v41 = vsub.f32 %v1437_v48, %v1478_v45 }
 0x587   : > { %v1487_v42 = vpop.xlane.xlu0 %1486 }
 0x588   : > { %3214 = vpow2.f32 %v1510_v47  ;;  %v1508_v51 = vmul.f32 1.442695, %v1500_v41  ;;  %v1503_v55 = vsub.f32 %v2910_v59, %v1487_v42 }
 0x589   : > { %v1484_v56 = vpop.xlane.xlu1 %1483 }
 0x58a   : > { %3216 = vpow2.f32 %v1508_v51  ;;  %v1514_v54 = vmul.f32 1.442695, %v1503_v55  ;;  %v1502_v49 = vsub.f32 %v1447_v61, %v1484_v56  ;;  %v4099_v51 = vpop.f32.mrf.mxu1 }
 0x58b   : > { %v4067_v53 = vpop.xlane.xlu0 %1492 }
 0x58c   : > { %3218 = vpow2.f32 %v1514_v54  ;;  %v1512_v12 = vmul.f32 1.442695, %v1502_v49  ;;  %v1061_v54 = vsel %vm671_vm2, %v4065_v50, -inf  ;;  %v4103_v49 = vpop.f32.mrf.mxu1 }
 0x58d   : > { %v4071_v52 = vpop.xlane.xlu1 %1489 }
 0x58e   : > { %3220 = vpow2.f32 %v1512_v12  ;;  %v1058_v12 = vsel %vm671_vm2, %v4069_v46, -inf }
 0x58f   : > { %v4073_v44 = vpop.xlane.xlu0 %1498 }
 0x590   : > { %v1507_v10 = vsub.f32 %v4017_v3, %v4073_v44 }
 0x591   : > { %v4077_v48 = vpop.xlane.xlu1 %1495 }
 0x593   : > { %v1169_v58 = vpop.permute.xlu0 %1168 }
 0x594   : > { %2861 = vmatprep.subr.mxu1 %v1169_v58 }
 0x595   : > { %v4079_v59 = vpop.eup %3214  ;;  %2862 = vmatpush3.msra.mxu1 %v1169_v58  ;;  %v1167_v61 = vpop.permute.xlu1 %1166 }
 0x596   : > { %2863 = vmatprep.subr.mxu1 %v1167_v61  ;;  %v1527_v62 = vsel %vm671_vm2, %v4079_v59, 0.0 }
 0x597   : > { %v4085_v57 = vpop.eup %3216  ;;  %1528 = vadd.xlane.f32.xlu0 %v1527_v62  ;;  %v1165_v1 = vpop.permute.xlu0 %1164  ;;  %2864 = vmatpush3.msra.mxu1 %v1167_v61  ;;  %v1070_v61 = vsel %vm671_vm2, %v4099_v51, -inf }
 0x598   : > { %2865 = vmatprep.subr.mxu1 %v1165_v1  ;;  %v1524_v4 = vsel %vm671_vm2, %v4085_v57, 0.0  ;;  %v4109_v62 = vpop.f32.mrf.mxu1 }
 0x599   : > { %v4089_v14 = vpop.eup %3218  ;;  %1525 = vadd.xlane.f32.xlu1 %v1524_v4  ;;  %2866 = vmatpush3.msra.mxu1 %v1165_v1  ;;  %v1161_v6 = vpop.permute.xlu1 %1160  ;;  %v1067_v1 = vsel %vm671_vm2, %v4075_v16, -inf }
 0x59a   : > { %v1533_v41 = vsel %vm671_vm2, %v4089_v14, 0.0 }
 0x59b   : > { %v4093_v45 = vpop.eup %3220  ;;  %v1163_v47 = vpop.permute.xlu0 %1162 }
 0x59c   : > { %2867 = vmatprep.subr.mxu1 %v1163_v47  ;;  %v1530_v42 = vsel %vm671_vm2, %v4093_v45, 0.0 }
 0x59d   : > { %1534 = vadd.xlane.f32.xlu1 %v1533_v41  ;;  %1531 = vadd.xlane.f32.xlu0 %v1530_v42  ;;  %v1159_v55 = vpop.permute.xlu1 %1158  ;;  %v1073_v41 = vsel %vm671_vm2, %v4091_v43, -inf  ;;  %v1079_v42 = vsel %vm671_vm2, %v4103_v49, -inf }
 0x59e   : > { %2868 = vmatpush3.msra.mxu1 %v1163_v47  ;;  %v1064_v47 = vsel %vm671_vm2, %v4081_v60, -inf }
 0x59f   : > { %2869 = vmatprep.subr.mxu1 %v1161_v6  ;;  %v1157_v56 = vpop.permute.xlu0 %1156 }
 0x5a0   : > { %2870 = vmatpush3.msra.mxu1 %v1161_v6  ;;  %v1076_v6 = vsel %vm671_vm2, %v4109_v62, -inf }
 0x5a1   : > { %2871 = vmatprep.subr.mxu1 %v1159_v55  ;;  %1062 = vmax.xlane.f32.xlu1 %v1061_v54  ;;  %v1155_v58 = vpop.permute.xlu1 %1154  ;;  %v1504_v54 = vsub.f32 %v4013_v0, %v4071_v52 }
 0x5a2   : > { %1059 = vmax.xlane.f32.xlu0 %v1058_v12  ;;  %2872 = vmatpush3.msra.mxu1 %v1159_v55  ;;  %v1505_v55 = vsub.f32 %v4009_v63, %v4067_v53 }
 0x5a3   : > { %2873 = vmatprep.subr.mxu1 %v1157_v56  ;;  %v4113_v4 = vpop.permute.xlu0 %1578  ;;  %v1516_v12 = vmul.f32 1.442695, %v1504_v54 }
 0x5a4   : > { %2874 = vmatpush3.msra.mxu1 %v1157_v56  ;;  %v1518_v56 = vmul.f32 1.442695, %v1505_v55 }
 0x5a5   : > { %2875 = vmatprep.subr.mxu1 %v1155_v58  ;;  %1071 = vmax.xlane.f32.xlu1 %v1070_v61  ;;  %v4144_v0 = vpop.permute.xlu1 %1576 }
 0x5a6   : > { %1068 = vmax.xlane.f32.xlu0 %v1067_v1  ;;  %2876 = vmatpush3.msra.mxu1 %v1155_v58  ;;  %3222 = vpow2.f32 %v1518_v56 }
 0x5a7   : > { %2917 = vmatprep.subr.mxu1 %v4113_v4  ;;  %3224 = vpow2.f32 %v1516_v12  ;;  %v4146_v53 = vpop.permute.xlu0 %1574 }
 0x5a9   : > { %1077 = vmax.xlane.f32.xlu1 %v1076_v6  ;;  %v4148_v52 = vpop.permute.xlu1 %1572 }
 0x5aa   : > { %1065 = vmax.xlane.f32.xlu0 %v1064_v47 }
 0x5ae   : > { %1074 = vmax.xlane.f32.xlu0 %v1073_v41 }
 0x5b2   : > { %1080 = vmax.xlane.f32.xlu0 %v1079_v42 }
 0x5b3   : > { %v4132_v58 = vpop.eup %3222 }
 0x5b4   : > { %v1539_v61 = vsel %vm671_vm2, %v4132_v58, 0.0  ;;  %v4136_v1 = vpop.eup %3224 }
 0x5b5   : > { %v1536_v63 = vsel %vm671_vm2, %v4136_v1, 0.0 }
 0x5ba   : > { %1568 = vrot.lane.b32.xlu1 %v3683_v30, %s3469_s20 }
 0x5c8   : > { %1570 = vrot.lane.b32.xlu0 %v3677_v27, %s3469_s20 }
 0x5de   : > { %1540 = vadd.xlane.f32.xlu1 %v1539_v61 }
 0x5e7   : > { %1537 = vadd.xlane.f32.xlu0 %v1536_v63 }
 0x5ef   : > { %1564 = vrot.lane.b32.xlu1 %v3673_v25, %s3469_s20 }
 0x5fd   : > { %1566 = vrot.lane.b32.xlu0 %v3667_v22, %s3469_s20 }
 0x620   : > { %v4150_v6 = vpop.xlane.xlu0 %1528 }
 0x622   : > { %v4152_v47 = vpop.xlane.xlu1 %1525 }
 0x626   : > { %v4154_v41 = vpop.xlane.xlu0 %1531  ;;  %v4156_v42 = vpop.xlane.xlu1 %1534 }
 0x62a   : > { %v1063_v55 = vpop.xlane.xlu1 %1062 }
 0x62b   : > { %v1060_v56 = vpop.xlane.xlu0 %1059  ;;  %v1083_v54 = vsub.f32 %v4065_v50, %v1063_v55  ;;  %v1506_v50 = vsub.f32 %v4021_v7, %v4077_v48 }
 0x62c   : > { %v1082_v12 = vsub.f32 %v4069_v46, %v1060_v56  ;;  %v1522_v46 = vmul.f32 1.442695, %v1507_v10 }
 0x62d   : > { %v1092_v61 = vmul.f32 1.442695, %v1083_v54 }
 0x62e   : > { %v1090_v63 = vmul.f32 1.442695, %v1082_v12  ;;  %v1072_v5 = vpop.xlane.xlu1 %1071 }
 0x62f   : > { %3226 = vpow2.f32 %v1092_v61  ;;  %v1069_v15 = vpop.xlane.xlu0 %1068  ;;  %v1086_v55 = vsub.f32 %v4099_v51, %v1072_v5 }
 0x630   : > { %3228 = vpow2.f32 %v1090_v63  ;;  %v1085_v9 = vsub.f32 %v4075_v16, %v1069_v15  ;;  %v1520_v16 = vmul.f32 1.442695, %v1506_v50 }
 0x631   : > { %v1098_v3 = vmul.f32 1.442695, %v1086_v55 }
 0x632   : > { %v1096_v13 = vmul.f32 1.442695, %v1085_v9  ;;  %v1078_v44 = vpop.xlane.xlu1 %1077 }
 0x633   : > { %v1066_v8 = vpop.xlane.xlu0 %1065  ;;  %v1088_v5 = vsub.f32 %v4109_v62, %v1078_v44 }
 0x634   : > { %3230 = vpow2.f32 %v1096_v13  ;;  %v1084_v2 = vsub.f32 %v4081_v60, %v1066_v8 }
 0x636   : > { %v1094_v56 = vmul.f32 1.442695, %v1084_v2 }
 0x637   : > { %v1075_v54 = vpop.xlane.xlu0 %1074 }
 0x638   : > { %3232 = vpow2.f32 %v1094_v56  ;;  %v1087_v15 = vsub.f32 %v4091_v43, %v1075_v54  ;;  %v1102_v43 = vmul.f32 1.442695, %v1088_v5 }
 0x639   : > { %3234 = vpow2.f32 %v1522_v46 }
 0x63a   : > { %v1100_v9 = vmul.f32 1.442695, %v1087_v15 }
 0x63b   : > { %v1081_v12 = vpop.xlane.xlu0 %1080 }
 0x63c   : > { %v4168_v13 = vpop.eup %3226  ;;  %3236 = vpow2.f32 %v1100_v9  ;;  %v1089_v8 = vsub.f32 %v4103_v49, %v1081_v12 }
 0x63d   : > { %v4171_v7 = vpop.eup %3228  ;;  %3238 = vpow2.f32 %v1520_v16  ;;  %v1109_v2 = vsel %vm671_vm2, %v4168_v13, 0.0 }
 0x63e   : > { %3240 = vpow2.f32 %v1098_v3  ;;  %v1104_v10 = vmul.f32 1.442695, %v1089_v8  ;;  %v1106_v48 = vsel %vm671_vm2, %v4171_v7, 0.0  ;;  %1110 = vadd.xlane.f32.xlu0 %v1109_v2 }
 0x63f   : > { %1107 = vadd.xlane.f32.xlu1 %v1106_v48 }
 0x640   : > { %3242 = vpow2.f32 %v1104_v10 }
 0x641   : > { %v4178_v60 = vpop.eup %3230  ;;  %3244 = vpow2.f32 %v1102_v43 }
 0x642   : > { %v1115_v51 = vsel %vm671_vm2, %v4178_v60, 0.0 }
 0x643   : > { %1116 = vadd.xlane.f32.xlu0 %v1115_v51 }
 0x645   : > { %v4182_v49 = vpop.eup %3232 }
 0x646   : > { %v1112_v62 = vsel %vm671_vm2, %v4182_v49, 0.0  ;;  %v4186_v61 = vpop.eup %3234 }
 0x647   : > { %1113 = vadd.xlane.f32.xlu1 %v1112_v62  ;;  %v1545_v46 = vsel %vm671_vm2, %v4186_v61, 0.0 }
 0x649   : > { %v4188_v63 = vpop.eup %3236 }
 0x64a   : > { %v4190_v50 = vpop.eup %3238  ;;  %v1121_v55 = vsel %vm671_vm2, %v4188_v63, 0.0 }
 0x64b   : > { %v4196_v56 = vpop.eup %3240  ;;  %1546 = vadd.xlane.f32.xlu1 %v1545_v46  ;;  %1122 = vadd.xlane.f32.xlu0 %v1121_v55  ;;  %v1542_v54 = vsel %vm671_vm2, %v4190_v50, 0.0 }
 0x64c   : > { %v1118_v15 = vsel %vm671_vm2, %v4196_v56, 0.0 }
 0x64d   : > { %v4202_v16 = vpop.eup %3242 }
 0x64e   : > { %v1127_v3 = vsel %vm671_vm2, %v4202_v16, 0.0  ;;  %v4206_v9 = vpop.eup %3244 }
 0x64f   : > { %1543 = vadd.xlane.f32.xlu0 %v1542_v54  ;;  %1119 = vadd.xlane.f32.xlu1 %v1118_v15  ;;  %v1124_v44 = vsel %vm671_vm2, %v4206_v9, 0.0 }
 0x653   : > { %1128 = vadd.xlane.f32.xlu1 %v1127_v3 }
 0x657   : > { %1125 = vadd.xlane.f32.xlu1 %v1124_v44 }
 0x665   : > { %1747 = vrot.lane.b32.xlu0 %v3702_v39, %s3470_s5 }
 0x668   : > { %1745 = vrot.lane.b32.xlu1 %v3695_v36, %s3470_s5 }
 0x669   : > { %1743 = vrot.lane.b32.xlu0 %v3689_v33, %s3470_s5 }
 0x66c   : > { %1741 = vrot.lane.b32.xlu1 %v3681_v29, %s3470_s5 }
 0x66d   : > { %1739 = vrot.lane.b32.xlu0 %v3675_v26, %s3470_s5 }
 0x670   : > { %1737 = vrot.lane.b32.xlu1 %v3669_v23, %s3470_s5 }
 0x671   : > { %1735 = vrot.lane.b32.xlu0 %v3663_v20, %s3470_s5 }
 0x674   : > { %1733 = vrot.lane.b32.xlu1 %v3659_v18, %s3470_s5  ;;  %v1569_v18 = vpop.permute.xlu1 %1568 }
 0x675   : > { %1717 = vrot.lane.b32.xlu0 %v3655_v17, %s3470_s5  ;;  %v1571_v17 = vpop.permute.xlu0 %1570 }
 0x678   : > { %1719 = vrot.lane.b32.xlu1 %v3661_v19, %s3470_s5  ;;  %v1541_v20 = vpop.xlane.xlu1 %1540 }
 0x679   : > { %1721 = vrot.lane.b32.xlu0 %v3665_v21, %s3470_s5  ;;  %v1538_v19 = vpop.xlane.xlu0 %1537 }
 0x67c   : > { %1723 = vrot.lane.b32.xlu1 %v3671_v24, %s3470_s5  ;;  %v1565_v23 = vpop.permute.xlu1 %1564 }
 0x67d   : > { %1725 = vrot.lane.b32.xlu0 %v3679_v28, %s3470_s5  ;;  %v1567_v21 = vpop.permute.xlu0 %1566 }
 0x680   : > { %1727 = vrot.lane.b32.xlu1 %v3685_v31, %s3470_s5 }
 0x681   : > { %1729 = vrot.lane.b32.xlu0 %v3691_v34, %s3470_s5 }
 0x684   : > { %1731 = vrot.lane.b32.xlu1 %v3697_v37, %s3470_s5 }
 0x6c7   : > { %v1111_v26 = vpop.xlane.xlu0 %1110 }
 0x6c8   : > { %3246 = vrcp.f32 %v1111_v26  ;;  %v1108_v24 = vpop.xlane.xlu1 %1107 }
 0x6c9   : > { %3248 = vrcp.f32 %v1108_v24 }
 0x6cc   : > { %v1117_v28 = vpop.xlane.xlu0 %1116 }
 0x6cd   : > { %3250 = vrcp.f32 %v1117_v28 }
 0x6d0   : > { %v1114_v29 = vpop.xlane.xlu1 %1113 }
 0x6d1   : > { %3252 = vrcp.f32 %v1114_v29 }
 0x6d4   : > { %v1547_v31 = vpop.xlane.xlu1 %1546  ;;  %v1123_v37 = vpop.xlane.xlu0 %1122 }
 0x6d5   : > { %v3247_v33 = vpop.eup %3246  ;;  %3254 = vrcp.f32 %v1123_v37 }
 0x6d6   : > { %v3249_v34 = vpop.eup %3248  ;;  %v1139_v36 = vmul.f32 %v3247_v33, %v4168_v13 }
 0x6d7   : > { %v1138_v39 = vmul.f32 %v3249_v34, %v4171_v7 }
 0x6d8   : > { %v1120_v12 = vpop.xlane.xlu1 %1119 }
 0x6d9   : > { %2877 = vmatprep.mubr.msk.f32.mxu1 %vm671_vm2, %v1138_v39  ;;  %3256 = vrcp.f32 %v1120_v12 }
 0x6da   : > { %2878 = vmatmul.mubr.msk.f32.vlgmr.msra.gmra.mxu1 %vm671_vm2, %v1139_v36  ;;  %v3251_v2 = vpop.eup %3250  ;;  %3258 = vrcp.f32 %v4152_v47 }
 0x6db   : > { %2918 = vmatpush3.msra.mxu1 %v4113_v4  ;;  %v1141_v4 = vmul.f32 %v3251_v2, %v4178_v60 }
 0x6dc   : > { %2919 = vmatprep.subr.mxu1 %v4144_v0  ;;  %v1129_v8 = vpop.xlane.xlu1 %1128 }
 0x6dd   : > { %2920 = vmatpush3.msra.mxu1 %v4144_v0  ;;  %3260 = vrcp.f32 %v1129_v8  ;;  %v1544_v0 = vpop.xlane.xlu0 %1543 }
 0x6de   : > { %v3253_v5 = vpop.eup %3252  ;;  %2921 = vmatprep.subr.mxu1 %v4146_v53 }
 0x6df   : > { %2922 = vmatpush3.msra.mxu1 %v4146_v53  ;;  %v1140_v13 = vmul.f32 %v3253_v5, %v4182_v49 }
 0x6e0   : > { %2923 = vmatprep.subr.mxu1 %v4148_v52  ;;  %v1126_v7 = vpop.xlane.xlu1 %1125 }
 0x6e1   : > { %2924 = vmatpush3.msra.mxu1 %v4148_v52  ;;  %3262 = vrcp.f32 %v1126_v7  ;;  %2880 = vmatprep.mubr.msk.f32.mxu1 %vm671_vm2, %v1140_v13  ;;  %v1748_v10 = vpop.permute.xlu0 %1747 }
 0x6e2   : > { %2925 = vmatprep.subr.mxu1 %v1571_v17  ;;  %2881 = vmatmul.mubr.msk.f32.gmra.mxu1 %vm671_vm2, %v1141_v4  ;;  %3264 = vrcp.f32 %v4150_v6  ;;  %v3255_v53 = vpop.eup %3254 }
 0x6e3   : > { %2926 = vmatpush3.msra.mxu1 %v1571_v17  ;;  %3266 = vrcp.f32 %v4154_v41  ;;  %v1143_v48 = vmul.f32 %v3255_v53, %v4188_v63 }
 0x6e4   : > { %2927 = vmatprep.subr.mxu1 %v1569_v18  ;;  %3268 = vrcp.f32 %v4156_v42 }
 0x6e5   : > { %2928 = vmatpush3.msra.mxu1 %v1569_v18  ;;  %3270 = vrcp.f32 %v1538_v19  ;;  %v1744_v43 = vpop.permute.xlu0 %1743 }
 0x6e6   : > { %2929 = vmatprep.subr.mxu1 %v1567_v21  ;;  %v3257_v47 = vpop.eup %3256  ;;  %3272 = vrcp.f32 %v1541_v20 }
 0x6e7   : > { %2930 = vmatpush3.msra.mxu1 %v1567_v21  ;;  %v1142_v52 = vmul.f32 %v3257_v47, %v4196_v56  ;;  %v3259_v6 = vpop.eup %3258  ;;  %3274 = vrcp.f32 %v1544_v0 }
 0x6e8   : > { %2931 = vmatprep.subr.mxu1 %v1565_v23  ;;  %3276 = vrcp.f32 %v1547_v31  ;;  %v1556_v62 = vmul.f32 %v3259_v6, %v4085_v57 }
 0x6e9   : > { %2932 = vmatpush3.msra.mxu1 %v1565_v23  ;;  %2883 = vmatprep.mubr.msk.f32.mxu1 %vm671_vm2, %v1142_v52  ;;  %v1740_v15 = vpop.permute.xlu0 %1739 }
 0x6ea   : > { %2945 = vmatprep.subr.msk.mxu1 %vm517_vm1, %v1748_v10  ;;  %2884 = vmatmul.mubr.msk.f32.gmra.mxu1 %vm671_vm2, %v1143_v48  ;;  %v3261_v41 = vpop.eup %3260 }
 0x6eb   : > { %v1145_v51 = vmul.f32 %v3261_v41, %v4202_v16  ;;  %v1746_v16 = vpop.permute.xlu1 %1745 }
 0x6ee   : > { %v3263_v60 = vpop.eup %3262 }
 0x6ef   : > { %v1144_v42 = vmul.f32 %v3263_v60, %v4206_v9  ;;  %v3265_v49 = vpop.eup %3264  ;;  %v1742_v18 = vpop.permute.xlu1 %1741 }
 0x6f0   : > { %v3267_v63 = vpop.eup %3266  ;;  %v1557_v46 = vmul.f32 %v3265_v49, %v4079_v59 }
 0x6f1   : > { %2886 = vmatprep.mubr.msk.f32.mxu1 %vm671_vm2, %v1144_v42  ;;  %v3269_v55 = vpop.eup %3268  ;;  %v1558_v56 = vmul.f32 %v3267_v63, %v4093_v45  ;;  %v1736_v45 = vpop.permute.xlu0 %1735 }
 0x6f2   : > { %2887 = vmatmul.mubr.msk.f32.gmra.mxu1 %vm671_vm2, %v1145_v51  ;;  %v3271_v54 = vpop.eup %3270  ;;  %v1559_v57 = vmul.f32 %v3269_v55, %v4089_v14 }
 0x6f3   : > { %2933 = vmatprep.mubr.msk.f32.mxu1 %vm671_vm2, %v1556_v62  ;;  %v3273_v3 = vpop.eup %3272  ;;  %v1560_v9 = vmul.f32 %v3271_v54, %v4136_v1  ;;  %v1738_v20 = vpop.permute.xlu1 %1737 }
 0x6f4   : > { %v3275_v59 = vpop.eup %3274  ;;  %v1561_v44 = vmul.f32 %v3273_v3, %v4132_v58 }
 0x6f5   : > { %v3277_v17 = vpop.eup %3276  ;;  %v1562_v19 = vmul.f32 %v3275_v59, %v4190_v50  ;;  %v1718_v1 = vpop.permute.xlu0 %1717 }
 0x6f6   : > { %2934 = vmatmul.mubr.msk.f32.vlgmr.msra.gmra.mxu1 %vm671_vm2, %v1557_v46  ;;  %v1563_v14 = vmul.f32 %v3277_v17, %v4186_v61 }
 0x6f7   : > { %2946 = vmatpush3.xpose.msk.msra.mxu1 %vm517_vm1, %v1748_v10  ;;  %2936 = vmatprep.mubr.msk.f32.mxu1 %vm671_vm2, %v1558_v56  ;;  %v1734_v58 = vpop.permute.xlu1 %1733 }
 0x6f8   : > { %2947 = vmatprep.subr.msk.mxu1 %vm517_vm1, %v1746_v16 }
 0x6f9   : > { %v1722_v50 = vpop.permute.xlu0 %1721 }
 0x6fa   : > { %2937 = vmatmul.mubr.msk.f32.gmra.mxu1 %vm671_vm2, %v1559_v57 }
 0x6fb   : > { %2948 = vmatpush3.xpose.msk.msra.mxu1 %vm517_vm1, %v1746_v16  ;;  %2939 = vmatprep.mubr.msk.f32.mxu1 %vm671_vm2, %v1560_v9  ;;  %v1720_v61 = vpop.permute.xlu1 %1719 }
 0x6fc   : > { %2949 = vmatprep.subr.msk.mxu1 %vm517_vm1, %v1744_v43 }
 0x6fd   : > { %v1726_v23 = vpop.permute.xlu0 %1725 }
 0x6fe   : > { %2940 = vmatmul.mubr.msk.f32.gmra.mxu1 %vm671_vm2, %v1561_v44 }
 0x6ff   : > { %2950 = vmatpush3.xpose.msk.msra.mxu1 %vm517_vm1, %v1744_v43  ;;  %2942 = vmatprep.mubr.msk.f32.mxu1 %vm671_vm2, %v1562_v19  ;;  %v1724_v21 = vpop.permute.xlu1 %1723 }
 0x700   : > { %2951 = vmatprep.subr.msk.mxu1 %vm517_vm1, %v1742_v18 }
 0x701   : > { %v1730_v24 = vpop.permute.xlu0 %1729 }
 0x702   : > { %2943 = vmatmul.mubr.msk.f32.gmra.mxu1 %vm671_vm2, %v1563_v14 }
 0x703   : > { %2952 = vmatpush3.xpose.msk.msra.mxu1 %vm517_vm1, %v1742_v18  ;;  %2961 = vmatprep.mubr.msk.f32.mxu1 %vm517_vm1, %v1718_v1  ;;  %v1728_v26 = vpop.permute.xlu1 %1727 }
 0x704   : > { %2953 = vmatprep.subr.msk.mxu1 %vm517_vm1, %v1740_v15 }
 0x707   : > { %2954 = vmatpush3.xpose.msk.msra.mxu1 %vm517_vm1, %v1740_v15  ;;  %v1732_v28 = vpop.permute.xlu1 %1731 }
 0x708   : > { %2955 = vmatprep.subr.msk.mxu1 %vm517_vm1, %v1738_v20 }
 0x70b   : > { %2956 = vmatpush3.xpose.msk.msra.mxu1 %vm517_vm1, %v1738_v20 }
 0x70c   : > { %2957 = vmatprep.subr.msk.mxu1 %vm517_vm1, %v1736_v45 }
 0x70f   : > { %2958 = vmatpush3.xpose.msk.msra.mxu1 %vm517_vm1, %v1736_v45 }
 0x710   : > { %2959 = vmatprep.subr.msk.mxu1 %vm517_vm1, %v1734_v58 }
 0x713   : > { %2960 = vmatpush3.xpose.msk.msra.mxu1 %vm517_vm1, %v1734_v58 }
 0x716   : > { %2962 = vmatmul.mubr.msk.f32.vlgmr.msra.gmra.mxu1 %vm517_vm1, %v1720_v61 }
 0x717   : > { %2964 = vmatprep.mubr.msk.f32.mxu1 %vm517_vm1, %v1722_v50 }
 0x71a   : > { %2965 = vmatmul.mubr.msk.f32.gmra.mxu1 %vm517_vm1, %v1724_v21 }
 0x71b   : > { %2967 = vmatprep.mubr.msk.f32.mxu1 %vm517_vm1, %v1726_v23 }
 0x71e   : > { %2968 = vmatmul.mubr.msk.f32.gmra.mxu1 %vm517_vm1, %v1728_v26 }
 0x71f   : > { %2970 = vmatprep.mubr.msk.f32.mxu1 %vm517_vm1, %v1730_v24 }
 0x722   : > { %2971 = vmatmul.mubr.msk.f32.gmra.mxu1 %vm517_vm1, %v1732_v28 }
 0x79a   : > { %v4309_v29 = vpop.f32.mrf.mxu1 }
 0x79c   : > { %v4311_v31 = vpop.f32.mrf.mxu1 }
 0x79d   : > { %v3122_v33 = vpack.i.bf16 %v4309_v29, %v4311_v31 }
 0x7a2   : > { %v4315_v34 = vpop.f32.mrf.mxu1 }
 0x7a4   : > { %v4317_v36 = vpop.f32.mrf.mxu1 }
 0x7a5   : > { %v3132_v37 = vpack.i.bf16 %v4315_v34, %v4317_v36 }
 0x7aa   : > { %v4321_v39 = vpop.f32.mrf.mxu1 }
 0x7ac   : > { %v4323_v12 = vpop.f32.mrf.mxu1 }
 0x7ad   : > { %v3147_v8 = vpack.i.bf16 %v4321_v39, %v4323_v12 }
 0x7b2   : > { %v4327_v2 = vpop.f32.mrf.mxu1 }
 0x7b4   : > { %v4329_v5 = vpop.f32.mrf.mxu1 }
 0x7b5   : > { %v3162_v13 = vpack.i.bf16 %v4327_v2, %v4329_v5 }
 0x7b6   : > { %v4333_v7 = vpop.f32.mrf.mxu1 }
 0x7b8   : > { %v4335_v4 = vpop.f32.mrf.mxu1 }
 0x7b9   : > { %v3127_v0 = vpack.i.bf16 %v4333_v7, %v4335_v4 }
 0x7ba   : > { %v4339_v53 = vpop.f32.mrf.mxu1 }
 0x7bc   : > { %v4341_v47 = vpop.f32.mrf.mxu1 }
 0x7bd   : > { %v3137_v52 = vpack.i.bf16 %v4339_v53, %v4341_v47 }
 0x7be   : > { %v4345_v10 = vpop.f32.mrf.mxu1 }
 0x7c0   : > { %v4347_v48 = vpop.f32.mrf.mxu1 }
 0x7c1   : > { %v3152_v6 = vpack.i.bf16 %v4345_v10, %v4347_v48 }
 0x7c2   : > { %v4351_v41 = vpop.f32.mrf.mxu1 }
 0x7c4   : > { %v4353_v60 = vpop.f32.mrf.mxu1 }
 0x7c5   : > { %v3172_v42 = vpack.i.bf16 %v4351_v41, %v4353_v60 }
 0x7d6   : > { %v2963_v43 = vpop.f32.mrf.mxu1 }
 0x7d7   : > { %v1889_v51 = vsel %vm671_vm2, %v2963_v43, -inf }
 0x7d8   : > { %1890 = vmax.xlane.f32.xlu1 %v1889_v51  ;;  %v1847_v49 = vpop.f32.mrf.mxu1 }
 0x7d9   : > { %v1886_v62 = vsel %vm671_vm2, %v1847_v49, -inf }
 0x7da   : > { %1887 = vmax.xlane.f32.xlu0 %v1886_v62  ;;  %v2966_v63 = vpop.f32.mrf.mxu1 }
 0x7db   : > { %v1895_v15 = vsel %vm671_vm2, %v2966_v63, -inf }
 0x7dc   : > { %v1857_v46 = vpop.f32.mrf.mxu1 }
 0x7dd   : > { %v1892_v55 = vsel %vm671_vm2, %v1857_v46, -inf }
 0x7de   : > { %1893 = vmax.xlane.f32.xlu0 %v1892_v55  ;;  %v2969_v56 = vpop.f32.mrf.mxu1 }
 0x7df   : > { %v1901_v57 = vsel %vm671_vm2, %v2969_v56, -inf }
 0x7e0   : > { %v1867_v54 = vpop.f32.mrf.mxu1 }
 0x7e1   : > { %v1898_v16 = vsel %vm671_vm2, %v1867_v54, -inf }
 0x7e2   : > { %1896 = vmax.xlane.f32.xlu0 %v1895_v15  ;;  %1899 = vmax.xlane.f32.xlu1 %v1898_v16  ;;  %v2972_v3 = vpop.f32.mrf.mxu1 }
 0x7e3   : > { %v1907_v9 = vsel %vm671_vm2, %v2972_v3, -inf }
 0x7e4   : > { %v4372_v59 = vpop.f32.mrf.mxu1 }
 0x7e5   : > { %v1904_v45 = vsel %vm671_vm2, %v4372_v59, -inf }
 0x7e6   : > { %1902 = vmax.xlane.f32.xlu0 %v1901_v57 }
 0x7ea   : > { %1908 = vmax.xlane.f32.xlu0 %v1907_v9 }
 0x7f3   : > { %1988 = vrot.lane.b32.xlu1 %v3699_v38, %s3470_s5 }
 0x7f7   : > { %1984 = vrot.lane.b32.xlu1 %v3687_v32, %s3470_s5 }
 0x800   : > { %1986 = vrot.lane.b32.xlu0 %v3704_v40, %s3470_s5 }
 0x804   : > { %1980 = vrot.lane.b32.xlu0 %v3677_v27, %s3470_s5 }
 0x81b   : > { %1905 = vmax.xlane.f32.xlu1 %v1904_v45 }
 0x82c   : > { %1982 = vrot.lane.b32.xlu1 %v3693_v35, %s3470_s5 }
 0x830   : > { %1978 = vrot.lane.b32.xlu1 %v3683_v30, %s3470_s5 }
 0x861   : > { %v1891_v38 = vpop.xlane.xlu1 %1890 }
 0x862   : > { %v1911_v32 = vsub.f32 %v2963_v43, %v1891_v38 }
 0x863   : > { %v1888_v44 = vpop.xlane.xlu0 %1887 }
 0x864   : > { %v1920_v17 = vmul.f32 1.442695, %v1911_v32  ;;  %v1910_v40 = vsub.f32 %v1847_v49, %v1888_v44 }
 0x866   : > { %3278 = vpow2.f32 %v1920_v17  ;;  %v1918_v18 = vmul.f32 1.442695, %v1910_v40 }
 0x867   : > { %v1894_v27 = vpop.xlane.xlu0 %1893 }
 0x868   : > { %3280 = vpow2.f32 %v1918_v18  ;;  %v1912_v19 = vsub.f32 %v1857_v46, %v1894_v27 }
 0x86a   : > { %v1922_v14 = vmul.f32 1.442695, %v1912_v19 }
 0x86b   : > { %v1897_v1 = vpop.xlane.xlu0 %1896  ;;  %v1900_v20 = vpop.xlane.xlu1 %1899 }
 0x86c   : > { %3282 = vpow2.f32 %v1922_v14  ;;  %v1913_v58 = vsub.f32 %v2966_v63, %v1897_v1  ;;  %v1914_v61 = vsub.f32 %v1867_v54, %v1900_v20 }
 0x86e   : > { %v1924_v35 = vmul.f32 1.442695, %v1913_v58  ;;  %v1926_v50 = vmul.f32 1.442695, %v1914_v61 }
 0x86f   : > { %v1903_v21 = vpop.xlane.xlu0 %1902  ;;  %v1989_v30 = vpop.permute.xlu1 %1988 }
 0x870   : > { %3284 = vpow2.f32 %v1924_v35  ;;  %v1915_v23 = vsub.f32 %v2969_v56, %v1903_v21  ;;  %2973 = vmatprep.subr.mxu0 %v1989_v30 }
 0x871   : > { %3286 = vpow2.f32 %v1926_v50  ;;  %2974 = vmatpush3.msra.mxu0 %v1989_v30 }
 0x872   : > { %v1928_v26 = vmul.f32 1.442695, %v1915_v23 }
 0x873   : > { %v4380_v24 = vpop.eup %3278  ;;  %v1909_v28 = vpop.xlane.xlu0 %1908 }
 0x874   : > { %3288 = vpow2.f32 %v1928_v26  ;;  %v1917_v43 = vsub.f32 %v2972_v3, %v1909_v28  ;;  %v1937_v51 = vsel %vm671_vm2, %v4380_v24, 0.0  ;;  %v1985_v56 = vpop.permute.xlu1 %1984  ;;  %v239_v26 = vld [vmem:[#allocation7 + $0x78] sm:$0xff]  ;;  %v237_v28 = vld [vmem:[#allocation7 + $0x68] sm:$0xff] }
 0x875   : > { %v3281_v49 = vpop.eup %3280  ;;  %1938 = vadd.xlane.f32.xlu0 %v1937_v51  ;;  %v235_v51 = vld [vmem:[#allocation7 + $0x58] sm:$0xff] }
 0x876   : > { %v1932_v62 = vmul.f32 1.442695, %v1917_v43  ;;  %v1934_v63 = vsel %vm671_vm2, %v3281_v49, 0.0  ;;  %v236_v43 = vld [vmem:[#allocation7 + $0x60] sm:$0xff] }
 0x877   : > { %v1987_v46 = vpop.permute.xlu0 %1986  ;;  %1935 = vadd.xlane.f32.xlu1 %v1934_v63  ;;  %v232_v63 = vld [vmem:[#allocation7 + $0x40] sm:$0xff] }
 0x878   : > { %3290 = vpow2.f32 %v1932_v62  ;;  %2975 = vmatprep.subr.mxu0 %v1987_v46  ;;  %v233_v62 = vld [vmem:[#allocation7 + $0x48] sm:$0xff] }
 0x879   : > { %v4385_v55 = vpop.eup %3282  ;;  %2976 = vmatpush3.msra.mxu0 %v1987_v46  ;;  %v231_v46 = vld [vmem:[#allocation7 + $0x38] sm:$0xff] }
 0x87a   : > { %2977 = vmatprep.subr.mxu0 %v1985_v56  ;;  %v1940_v54 = vsel %vm671_vm2, %v4385_v55, 0.0 }
 0x87b   : > { %1941 = vadd.xlane.f32.xlu1 %v1940_v54  ;;  %2978 = vmatpush3.msra.mxu0 %v1985_v56  ;;  %v1981_v27 = vpop.permute.xlu0 %1980  ;;  %v229_v56 = vld [vmem:[#allocation7 + $0x28] sm:$0xff]  ;;  %v228_v54 = vld [vmem:[#allocation7 + $0x20] sm:$0xff] }
 0x87d   : > { %v4389_v15 = vpop.eup %3284 }
 0x87e   : > { %v4391_v16 = vpop.eup %3286  ;;  %v1943_v57 = vsel %vm671_vm2, %v4389_v15, 0.0 }
 0x87f   : > { %1944 = vadd.xlane.f32.xlu0 %v1943_v57  ;;  %v1946_v3 = vsel %vm671_vm2, %v4391_v16, 0.0  ;;  %v225_v57 = vld [vmem:[#allocation7 + $0x8] sm:$0xff] }
 0x880   : > { %1947 = vadd.xlane.f32.xlu1 %v1946_v3  ;;  %v224_v3 = vld [vmem:[#allocation7] sm:$0xff] }
 0x881   : > { %v4397_v9 = vpop.eup %3288 }
 0x882   : > { %v1949_v45 = vsel %vm671_vm2, %v4397_v9, 0.0 }
 0x883   : > { %1950 = vadd.xlane.f32.xlu0 %v1949_v45 }
 0x885   : > { %v4401_v38 = vpop.eup %3290 }
 0x886   : > { %v1955_v32 = vsel %vm671_vm2, %v4401_v38, 0.0 }
 0x887   : > { %1956 = vadd.xlane.f32.xlu0 %v1955_v32 }
 0x89d   : > { %1976 = vrot.lane.b32.xlu0 %v3667_v22, %s3470_s5 }
 0x8a1   : > { %3123 = vrot.lane.b32.xlu0 %v3122_v33, %s3470_s5 }
 0x8a4   : > { %v1906_v44 = vpop.xlane.xlu1 %1905 }
 0x8a5   : > { %v1916_v17 = vsub.f32 %v4372_v59, %v1906_v44  ;;  %3138 = vrot.lane.b32.xlu0 %v3137_v52, %s3469_s20 }
 0x8a7   : > { %v1930_v40 = vmul.f32 1.442695, %v1916_v17 }
 0x8a8   : > { %v1983_v18 = vpop.permute.xlu1 %1982 }
 0x8a9   : > { %3292 = vpow2.f32 %v1930_v40  ;;  %2979 = vmatprep.subr.mxu0 %v1983_v18 }
 0x8aa   : > { %2980 = vmatpush3.msra.mxu0 %v1983_v18 }
 0x8ab   : > { %2981 = vmatprep.subr.mxu0 %v1981_v27 }
 0x8ac   : > { %2982 = vmatpush3.msra.mxu0 %v1981_v27  ;;  %v1979_v22 = vpop.permute.xlu1 %1978 }
 0x8ad   : > { %2983 = vmatprep.subr.mxu0 %v1979_v22 }
 0x8ae   : > { %2984 = vmatpush3.msra.mxu0 %v1979_v22 }
 0x8b6   : > { %v3293_v29 = vpop.eup %3292 }
 0x8b7   : > { %v1952_v31 = vsel %vm671_vm2, %v3293_v29, 0.0 }
 0x8b8   : > { %1953 = vadd.xlane.f32.xlu1 %v1952_v31 }
 0x8c9   : > { %1974 = vrot.lane.b32.xlu1 %v3673_v25, %s3470_s5 }
 0x8cd   : > { %3128 = vrot.lane.b32.xlu1 %v3127_v0, %s3469_s20 }
 0x8d1   : > { %3133 = vrot.lane.b32.xlu1 %v3132_v37, %s3470_s5 }
 0x8d5   : > { %3153 = vrot.lane.b32.xlu1 %v3152_v6, %s3469_s20 }
 0x8fe   : > { %v1939_v53 = vpop.xlane.xlu0 %1938 }
 0x900   : > { %v1936_v33 = vpop.xlane.xlu1 %1935 }
 0x901   : > { %3294 = vrcp.f32 %v1936_v33 }
 0x902   : > { %3296 = vrcp.f32 %v1939_v53 }
 0x904   : > { %v1942_v34 = vpop.xlane.xlu1 %1941 }
 0x905   : > { %3298 = vrcp.f32 %v1942_v34 }
 0x908   : > { %v1945_v47 = vpop.xlane.xlu0 %1944 }
 0x909   : > { %v1948_v36 = vpop.xlane.xlu1 %1947  ;;  %3300 = vrcp.f32 %v1945_v47 }
 0x90a   : > { %3302 = vrcp.f32 %v1948_v36 }
 0x90c   : > { %v1951_v25 = vpop.xlane.xlu0 %1950 }
 0x90d   : > { %3304 = vrcp.f32 %v1951_v25 }
 0x90e   : > { %v3295_v52 = vpop.eup %3294 }
 0x90f   : > { %v1966_v59 = vmul.f32 %v3295_v52, %v3281_v49  ;;  %v3297_v4 = vpop.eup %3296  ;;  %v234_v49 = vld [vmem:[#allocation7 + $0x50] sm:$0xff] }
 0x910   : > { %v1957_v19 = vpop.xlane.xlu0 %1956  ;;  %v1967_v48 = vmul.f32 %v3297_v4, %v4380_v24  ;;  %v238_v24 = vld [vmem:[#allocation7 + $0x70] sm:$0xff] }
 0x911   : > { %2989 = vmatprep.mubr.msk.f32.mxu0 %vm671_vm2, %v1966_v59  ;;  %3306 = vrcp.f32 %v1957_v19 }
 0x912   : > { %v3299_v0 = vpop.eup %3298 }
 0x913   : > { %v1968_v14 = vmul.f32 %v3299_v0, %v4385_v55  ;;  %v230_v55 = vld [vmem:[#allocation7 + $0x30] sm:$0xff] }
 0x914   : > { %v1977_v7 = vpop.permute.xlu0 %1976  ;;  %v4570_v0 = vld [vmem:[#allocation14_spill] sm:$0xff] }
 0x915   : > { %2985 = vmatprep.subr.mxu0 %v1977_v7 }
 0x916   : > { %2986 = vmatpush3.msra.mxu0 %v1977_v7  ;;  %v3301_v6 = vpop.eup %3300 }
 0x917   : > { %v3303_v1 = vpop.eup %3302  ;;  %v1969_v20 = vmul.f32 %v3301_v6, %v4389_v15  ;;  %v227_v15 = vld [vmem:[#allocation7 + $0x18] sm:$0xff] }
 0x918   : > { %v1970_v61 = vmul.f32 %v3303_v1, %v4391_v16  ;;  %v226_v16 = vld [vmem:[#allocation7 + $0x10] sm:$0xff]  ;;  %v3124_v12 = vpop.permute.xlu0 %3123 }
 0x919   : > { %v3126_v53 = vunpack.i.h.bf16 %v3124_v12  ;;  %v3125_v47 = vunpack.i.l.bf16 %v3124_v12 }
 0x91a   : > { %v3305_v58 = vpop.eup %3304 }
 0x91b   : > { %v1971_v50 = vmul.f32 %v3305_v58, %v4397_v9  ;;  %v2224_v19 = vsel %vm517_vm1, %v4049_v11, %v3126_v53 }
 0x91c   : > { %v3139_v33 = vpop.permute.xlu0 %3138 }
 0x91d   : > { %v3141_v11 = vunpack.i.h.bf16 %v3139_v33 }
 0x91e   : > { %v3307_v35 = vpop.eup %3306 }
 0x91f   : > { %v1973_v23 = vmul.f32 %v3307_v35, %v4401_v38 }
 0x941   : > { %v1954_v37 = vpop.xlane.xlu1 %1953 }
 0x942   : > { %3308 = vrcp.f32 %v1954_v37 }
 0x945   : > { %v1975_v10 = vpop.permute.xlu1 %1974 }
 0x946   : > { %2987 = vmatprep.subr.mxu0 %v1975_v10 }
 0x947   : > { %2988 = vmatpush3.msra.mxu0 %v1975_v10 }
 0x948   : > { %2990 = vmatmul.mubr.msk.f32.vlgmr.msra.gmra.mxu0 %vm671_vm2, %v1967_v48  ;;  %3001 = vmatprep.subr.mxu0 %v239_v26  ;;  %v4571_v48 = vld [vmem:[#allocation13_spill] sm:$0xff] }
 0x949   : > { %2992 = vmatprep.mubr.msk.f32.mxu0 %vm671_vm2, %v1968_v14  ;;  %3002 = vmatpush3.msra.mxu0 %v239_v26  ;;  %v3129_v39 = vpop.permute.xlu1 %3128  ;;  %v3140_v14 = vunpack.i.l.bf16 %v3139_v33 }
 0x94a   : > { %3003 = vmatprep.subr.mxu0 %v238_v24  ;;  %v3131_v25 = vunpack.i.h.bf16 %v3129_v39  ;;  %v3130_v2 = vunpack.i.l.bf16 %v3129_v39 }
 0x94b   : > { %3004 = vmatpush3.msra.mxu0 %v238_v24  ;;  %v4572_v24 = vld [vmem:[#allocation16_spill] sm:$0xff] }
 0x94c   : > { %2993 = vmatmul.mubr.msk.f32.gmra.mxu0 %vm671_vm2, %v1969_v20  ;;  %3005 = vmatprep.subr.mxu0 %v237_v28  ;;  %v2232_v34 = vsel %vm671_vm2, %v2224_v19, %v3131_v25 }
 0x94d   : > { %2995 = vmatprep.mubr.msk.f32.mxu0 %vm671_vm2, %v1970_v61  ;;  %3006 = vmatpush3.msra.mxu0 %v237_v28 }
 0x94e   : > { %3007 = vmatprep.subr.mxu0 %v236_v43 }
 0x94f   : > { %v3309_v21 = vpop.eup %3308  ;;  %3008 = vmatpush3.msra.mxu0 %v236_v43  ;;  %v4573_v43 = vld [vmem:[#allocation15_spill] sm:$0xff] }
 0x950   : > { %2996 = vmatmul.mubr.msk.f32.gmra.mxu0 %vm671_vm2, %v1971_v50  ;;  %v1972_v30 = vmul.f32 %v3309_v21, %v3293_v29  ;;  %3009 = vmatprep.subr.mxu0 %v235_v51 }
 0x951   : > { %3010 = vmatpush3.msra.mxu0 %v235_v51 }
 0x952   : > { %2998 = vmatprep.mubr.msk.f32.mxu0 %vm671_vm2, %v1972_v30  ;;  %3011 = vmatprep.subr.mxu0 %v234_v49 }
 0x953   : > { %3012 = vmatpush3.msra.mxu0 %v234_v49 }
 0x954   : > { %2999 = vmatmul.mubr.msk.f32.gmra.mxu0 %vm671_vm2, %v1973_v23  ;;  %3013 = vmatprep.subr.mxu0 %v233_v62 }
 0x955   : > { %3014 = vmatpush3.msra.mxu0 %v233_v62 }
 0x956   : > { %3015 = vmatprep.subr.mxu0 %v232_v63 }
 0x957   : > { %3016 = vmatpush3.msra.mxu0 %v232_v63 }
 0x958   : > { %3017 = vmatprep.subr.mxu0 %v231_v46 }
 0x959   : > { %3018 = vmatpush3.msra.mxu0 %v231_v46 }
 0x95a   : > { %3019 = vmatprep.subr.mxu0 %v230_v55 }
 0x95b   : > { %3020 = vmatpush3.msra.mxu0 %v230_v55 }
 0x95c   : > { %3021 = vmatprep.subr.mxu0 %v229_v56 }
 0x95d   : > { %3022 = vmatpush3.msra.mxu0 %v229_v56 }
 0x95e   : > { %3023 = vmatprep.subr.mxu0 %v228_v54 }
 0x95f   : > { %3024 = vmatpush3.msra.mxu0 %v228_v54 }
 0x960   : > { %3025 = vmatprep.subr.mxu0 %v227_v15 }
 0x961   : > { %3026 = vmatpush3.msra.mxu0 %v227_v15 }
 0x962   : > { %3027 = vmatprep.subr.mxu0 %v226_v16 }
 0x963   : > { %3028 = vmatpush3.msra.mxu0 %v226_v16 }
 0x964   : > { %3029 = vmatprep.subr.mxu0 %v225_v57 }
 0x965   : > { %3030 = vmatpush3.msra.mxu0 %v225_v57 }
 0x966   : > { %3031 = vmatprep.subr.mxu0 %v224_v3 }
 0x967   : > { %3032 = vmatpush3.msra.mxu0 %v224_v3 }
 0xa08   : > { %v2991_v9 = vpop.f32.mrf.mxu0 }
 0xa0a   : > { %v2088_v45 = vpop.f32.mrf.mxu0 }
 0xa0b   : > { %v3142_v38 = vpack.i.bf16 %v2991_v9, %v2088_v45 }
 0xa0c   : > { %v2994_v32 = vpop.f32.mrf.mxu0 }
 0xa0d   : > { %3143 = vrot.lane.b32.xlu0 %v3142_v38, %s3468_s18 }
 0xa0e   : > { %v2098_v44 = vpop.f32.mrf.mxu0 }
 0xa0f   : > { %v3157_v17 = vpack.i.bf16 %v2994_v32, %v2098_v44 }
 0xa10   : > { %v2997_v40 = vpop.f32.mrf.mxu0 }
 0xa11   : > { %3148 = vrot.lane.b32.xlu0 %v3147_v8, %s3470_s5  ;;  %3158 = vrot.lane.b32.xlu1 %v3157_v17, %s3468_s18  ;;  %v3134_v8 = vpop.permute.xlu1 %3133 }
 0xa12   : > { %v2108_v18 = vpop.f32.mrf.mxu0  ;;  %v3136_v5 = vunpack.i.h.bf16 %v3134_v8 }
 0xa13   : > { %v3167_v27 = vpack.i.bf16 %v2997_v40, %v2108_v18  ;;  %v4574_v18 = vld [vmem:[#allocation18_spill] sm:$0xff] }
 0xa14   : > { %v3000_v22 = vpop.f32.mrf.mxu0  ;;  %v2226_v6 = vsel %vm517_vm1, %v4571_v48, %v3136_v5 }
 0xa15   : > { %3163 = vrot.lane.b32.xlu1 %v3162_v13, %s3470_s5  ;;  %3168 = vrot.lane.b32.xlu0 %v3167_v27, %s3468_s18  ;;  %v3135_v13 = vunpack.i.l.bf16 %v3134_v8  ;;  %v3154_v52 = vpop.permute.xlu1 %3153  ;;  %v2234_v30 = vsel %vm671_vm2, %v2226_v6, %v3141_v11 }
 0xa16   : > { %v2118_v29 = vpop.f32.mrf.mxu0  ;;  %v3156_v49 = vunpack.i.h.bf16 %v3154_v52  ;;  %v3155_v62 = vunpack.i.l.bf16 %v3154_v52 }
 0xa17   : > { %v3177_v31 = vpack.i.bf16 %v3000_v22, %v2118_v29  ;;  %v2225_v10 = vsel %vm517_vm1, %v4570_v0, %v3135_v13  ;;  %v4575_v22 = vld [vmem:[#allocation17_spill] sm:$0xff] }
 0xa18   : > { %v2233_v21 = vsel %vm671_vm2, %v2225_v10, %v3140_v14 }
 0xa19   : > { %3173 = vrot.lane.b32.xlu0 %v3172_v42, %s3469_s20  ;;  %3178 = vrot.lane.b32.xlu1 %v3177_v31, %s3468_s18  ;;  %v4569_v42 = vld [vmem:[#allocation12_spill] sm:$0xff] }
 0xa1a   : > { %v2223_v7 = vsel %vm517_vm1, %v4569_v42, %v3125_v47 }
 0xa1b   : > { %v2231_v36 = vsel %vm671_vm2, %v2223_v7, %v3130_v2 }
 0xa7f   : > { %v3144_v59 = vpop.permute.xlu0 %3143 }
 0xa80   : > { %v3146_v41 = vunpack.i.h.bf16 %v3144_v59  ;;  %v3145_v60 = vunpack.i.l.bf16 %v3144_v59 }
 0xa82   : > { %v2240_v37 = vsel %vm2239_vm3, %v2231_v36, %v3145_v60  ;;  %v2241_v4 = vsel %vm2239_vm3, %v2232_v34, %v3146_v41 }
 0xa83   : > { %v3149_v1 = vpop.permute.xlu0 %3148  ;;  %v3159_v20 = vpop.permute.xlu1 %3158  ;;  %3033 = vmatprep.mubr.f32.mxu0 %v2240_v37 }
 0xa84   : > { %v3151_v58 = vunpack.i.h.bf16 %v3149_v1  ;;  %v3150_v61 = vunpack.i.l.bf16 %v3149_v1  ;;  %v3161_v35 = vunpack.i.h.bf16 %v3159_v20  ;;  %v3160_v50 = vunpack.i.l.bf16 %v3159_v20  ;;  %3034 = vmatmul.mubr.f32.vlgmr.msra.gmra.mxu0 %v2241_v4 }
 0xa86   : > { %v2242_v23 = vsel %vm2239_vm3, %v2233_v21, %v3160_v50  ;;  %v2243_v26 = vsel %vm2239_vm3, %v2234_v30, %v3161_v35  ;;  %v2227_v28 = vsel %vm517_vm1, %v4572_v24, %v3150_v61  ;;  %v2228_v51 = vsel %vm517_vm1, %v4573_v43, %v3151_v58 }
 0xa87   : > { %v3169_v63 = vpop.permute.xlu0 %3168  ;;  %v3164_v46 = vpop.permute.xlu1 %3163  ;;  %3036 = vmatprep.mubr.f32.mxu0 %v2242_v23  ;;  %v2235_v16 = vsel %vm671_vm2, %v2227_v28, %v3155_v62  ;;  %v2236_v57 = vsel %vm671_vm2, %v2228_v51, %v3156_v49 }
 0xa88   : > { %v3171_v55 = vunpack.i.h.bf16 %v3169_v63  ;;  %v3170_v56 = vunpack.i.l.bf16 %v3169_v63  ;;  %3037 = vmatmul.mubr.f32.gmra.mxu0 %v2243_v26  ;;  %v3166_v54 = vunpack.i.h.bf16 %v3164_v46  ;;  %v3165_v15 = vunpack.i.l.bf16 %v3164_v46 }
 0xa8a   : > { %v2244_v3 = vsel %vm2239_vm3, %v2235_v16, %v3170_v56  ;;  %v2245_v9 = vsel %vm2239_vm3, %v2236_v57, %v3171_v55  ;;  %v2229_v27 = vsel %vm517_vm1, %v4574_v18, %v3165_v15  ;;  %v2230_v29 = vsel %vm517_vm1, %v4575_v22, %v3166_v54 }
 0xa8b   : > { %v3174_v45 = vpop.permute.xlu0 %3173  ;;  %v3179_v38 = vpop.permute.xlu1 %3178  ;;  %3039 = vmatprep.mubr.f32.mxu0 %v2244_v3 }
 0xa8c   : > { %v3176_v32 = vunpack.i.h.bf16 %v3174_v45  ;;  %v3175_v44 = vunpack.i.l.bf16 %v3174_v45  ;;  %v3181_v17 = vunpack.i.h.bf16 %v3179_v38  ;;  %v3180_v40 = vunpack.i.l.bf16 %v3179_v38  ;;  %3040 = vmatmul.mubr.f32.gmra.mxu0 %v2245_v9 }
 0xa8e   : > { %v2237_v31 = vsel %vm671_vm2, %v2229_v27, %v3175_v44  ;;  %v2238_v39 = vsel %vm671_vm2, %v2230_v29, %v3176_v32 }
 0xa8f   : > { %v2246_v12 = vsel %vm2239_vm3, %v2237_v31, %v3180_v40  ;;  %v2247_v8 = vsel %vm2239_vm3, %v2238_v39, %v3181_v17 }
 0xa90   : > { %3042 = vmatprep.mubr.f32.mxu0 %v2246_v12 }
 0xa91   : > { %3043 = vmatmul.mubr.f32.gmra.mxu0 %v2247_v8 }
 0xb44   : > { %v3035_v33 = vpop.f32.mrf.mxu0 }
 0xb45   : > { %2354 = vst [vmem:[%s217_s27 + $0x8] sm:$0xff] %v3035_v33 }
 0xb46   : > { %v2314_v53 = vpop.f32.mrf.mxu0 }
 0xb47   : > { %2353 = vst [vmem:[%s217_s27] sm:$0xff] %v2314_v53 }
 0xb48   : > { %v3038_v47 = vpop.f32.mrf.mxu0 }
 0xb49   : > { %2356 = vst [vmem:[%s217_s27 + $0x18] sm:$0xff] %v3038_v47 }
 0xb4a   : > { %v2324_v25 = vpop.f32.mrf.mxu0 }
 0xb4b   : > { %2355 = vst [vmem:[%s217_s27 + $0x10] sm:$0xff] %v2324_v25 }
 0xb4c   : > { %v3041_v2 = vpop.f32.mrf.mxu0 }
 0xb4d   : > { %2358 = vst [vmem:[%s217_s27 + $0x28] sm:$0xff] %v3041_v2 }
 0xb4e   : > { %v2334_v5 = vpop.f32.mrf.mxu0 }
 0xb4f   : > { %2357 = vst [vmem:[%s217_s27 + $0x20] sm:$0xff] %v2334_v5 }
 0xb51   : > { %v3044_v13 = vpop.f32.mrf.mxu0 }
 0xb52   : > { %2360 = vst [vmem:[%s217_s27 + $0x38] sm:$0xff] %v3044_v13 }
 0xb53   : > { %v2344_v52 = vpop.f32.mrf.mxu0 }
 0xb54   : > { %2359 = vst [vmem:[%s217_s27 + $0x30] sm:$0xff] %v2344_v52 }
 0xb55   : > { %3403 = shalt.err (!%p3400_p9)
}
 0xb56   : > { %s3404_s8 = scalar_lea.hbm %s4500_s24, 1024  ;;  %s3408_s18 = scalar_lea.hbm %s4546_s3, 2048 }
 0xb57   : > { %p3405_p13 = scmp.ne.s32.totalorder %s4500_s24, %s3404_s8  ;;  %p3409_p4 = scmp.lt.s32.totalorder %s4500_s24, %s4546_s3 }
 0xb58   : > { %p3410_p8 = scmp.lt.s32.totalorder %s3408_s18, %s3404_s8 }
 0xb59   : > { %p3406_p5 = pnand %p3405_p13, %p4576_p10 }
 0xb5a   : > { %p3411_p7 = por %p3410_p8, %p3409_p4 }
 0xb5b   : > { %p3407_p0 = pneg %p3406_p5 }
 0xb5d   : > { %p3412_p11 = pnand %p3411_p7, %p3407_p0 }
 0xb5f   : > { %3415 = shalt.err (!%p3412_p11)
}
 0xb60   : > { %s3472_s6 = smov 128   ;;  %s3473_s27 = smov 8  }
 0xb61   : > { %3055 = dma.vmem_to_hbm [thread:$0]  (%p4576_p10), %s4495_s29, 1024, %s4500_s24, %s2362_s22, %s3472_s6, %s3472_s6, %s3473_s27  }
 0xb62 PF: > { %s2390_s30 = sand.u32 1, %s3446_s12   ;;  %p4577_p1 = scmp.ne.s32.totalorder %s4552_s19, 0 }
 0xb63   : > { %p4578_p2 = scmp.ge.s32.totalorder %s3458_s15, 2  ;;  %s2391_s4 = scalar_lea.sflag [#allocation4], %s2390_s30 }
 0xb65   : > { %p3069_p6 = pnand %p4578_p2, %p4577_p1 }
 0xb67   : > { %p3070_p12 = pneg %p3069_p6 }
 0xb69   : > { %3441 = dma.done.wait (%p3070_p12), %s2391_s4, 1024  }
 0xb6a   : > { %3443 = vsyncadd (%p3070_p12), %s2391_s4, 4294966272  ;;  %p17_p3 = scmp.ge.s32.totalorder %s3569_s9, 4   ;;  %s4579_s12 = smov %s3450_s13 }
 0xb6b   : > { %s4580_s13 = smov %s3454_s14  ;;  %s4581_s14 = smov %s3578_s17 }
 0xb6c   : > { %s4582_s15 = smov %s3569_s9  ;;  %19 = sbr.rel (!%p17_p3) target bundleno = 6 (0x6), region = 85 }
 0xb71   :  { %2396 = vsyncpa [#allocation3], 1 }
 0xb72   :  { %2398 = vsyncpa [#allocation3 + $0x1], 1 }
 0xb73   :  { %2399 = vsyncpa [#allocation6], 1 }
 0xb74   :  { %2400 = vsyncpa [#allocation4], 1 }
 0xb75   :  { %2402 = vsyncpa [#allocation4 + $0x1], 1 }

</bundles_post_ra>
